<compile_context>
chip_gen: v5e
topology: v5e:2x2
jax: 0.10.0
libtpu: 0.0.40
codegen_flags: <defaults>
</compile_context>

<pallas_src>
import functools

import jax
import jax.numpy as jnp
from jax import lax
from jax.experimental import pallas as pl
from jax.experimental.pallas import tpu as pltpu

_BN_EPS = 1e-5


def _pick_block_h(ho, wo, block_h=None, max_tile_elems=2048):
    """Output-row tile TH: divides Ho, and TH*Wo is a multiple of 128 (lane-dense, legal
    non-full block along the flattened spatial dim). Fallback: full Ho."""
    if block_h is not None:
        if ho % block_h or (block_h != ho and (block_h * wo) % 128):
            raise ValueError(f"block_h={block_h} incompatible with Ho={ho}, Wo={wo}")
        return block_h
    best = None
    for th in range(1, ho + 1):
        if ho % th == 0 and (th * wo) % 128 == 0 and th * wo <= max_tile_elems:
            best = th
    return best if best is not None else ho


def _pick_spatial_tile(s_total, max_tile_elems=2048):
    """Spatial tile for the normalize pass: a multiple of 128 dividing Ho*Wo, else full."""
    best = None
    for ts in range(128, min(s_total, max_tile_elems) + 1, 128):
        if s_total % ts == 0:
            best = ts
    return best if best is not None else s_total


def _conv_stats_kernel(xp_ref, w_ref, y_ref, sum_ref, ssq_ref, *, k, d, th, wo):
    # xp_ref : (1, Hp, Wp, Cin)  padded NHWC image of the current batch element
    # w_ref  : (k*k, Cin, nOut)  per-tap weights, w_ref[ki*k+kj] == weight[:, :, ki, kj].T
    # y_ref  : (1, nOut, TH*Wo)  conv-output tile, channel-major / lane-dense
    # sum_ref, ssq_ref : (1, nOut)  global per-channel sum(y) / sum(y*y) accumulators
    n = pl.program_id(0)
    hb = pl.program_id(1)

    @pl.when((n == 0) & (hb == 0))
    def _init_stats():
        sum_ref[...] = jnp.zeros_like(sum_ref)
        ssq_ref[...] = jnp.zeros_like(ssq_ref)

    cin = w_ref.shape[1]
    nout = w_ref.shape[2]
    tm = th * wo
    h0 = hb * th  # first output row of this tile

    # In-kernel im2col: k*k shifted (tm, cin) patches, accumulated through the MXU in f32.
    acc = jnp.zeros((tm, nout), jnp.float32)
    for ki in range(k):
        for kj in range(k):
            patch = xp_ref[0, pl.ds(h0 + ki * d, th), pl.ds(kj * d, wo), :]
            acc = acc + jnp.dot(patch.reshape(tm, cin), w_ref[ki * k + kj],
                                preferred_element_type=jnp.float32)

    # Per-channel batch statistics, accumulated across every grid step.
    sum_ref[...] += jnp.sum(acc, axis=0, keepdims=True)
    ssq_ref[...] += jnp.sum(acc * acc, axis=0, keepdims=True)

    # Store channel-major (nOut, tm): lane-dense stores, NCHW-compatible flat layout.
    y_ref[0, :, :] = acc.T


def _bn_prelu_kernel(y_ref, scale_ref, shift_ref, alpha_ref, o_ref):
    # y_ref/o_ref : (1, nOut, TS)   scale/shift : (nOut, 1)   alpha : (1,) in SMEM
    z = y_ref[0, :, :] * scale_ref[...] + shift_ref[...]
    alpha = alpha_ref[0]
    o_ref[0, :, :] = jnp.where(z > 0, z, alpha * z)


@functools.partial(jax.jit, static_argnames=("k", "p", "s", "d", "block_h"))
def convlayer_forward(x, weight, bias, gamma, beta, alpha,
                      *, k=3, p=1, s=1, d=1, block_h=None):
    """x: (N, nIn, H, W) f32 -> (N, nOut, Ho, Wo) f32.

    `bias` is accepted for interface parity but intentionally unused: under training-mode
    BatchNorm the per-channel conv bias is removed exactly by the batch-mean subtraction
    and does not change the variance.
    """
    if s != 1:
        # TODO(synk): stride > 1 (strided pl.ds windows) not implemented; module default s=1.
        raise NotImplementedError("Pallas convlayer path supports stride == 1 only")
    del bias

    n_b, cin, h, w = x.shape
    nout = weight.shape[0]
    ho = (h + 2 * p - d * (k - 1) - 1) // s + 1
    wo = (w + 2 * p - d * (k - 1) - 1) // s + 1
    s_sp = ho * wo
    hp, wp = h + 2 * p, w + 2 * p

    # Padded NHWC input: the only extra HBM copy of the input (no im2col materialization).
    xp = jnp.pad(x.astype(jnp.float32), ((0, 0), (0, 0), (p, p), (p, p)))
    xp = xp.transpose(0, 2, 3, 1)                                   # (N, Hp, Wp, Cin)
    # Per-tap weights: w_taps[ki*k+kj] = weight[:, :, ki, kj].T -> (Cin, nOut)
    w_taps = weight.astype(jnp.float32).transpose(2, 3, 1, 0).reshape(k * k, cin, nout)

    th = _pick_block_h(ho, wo, block_h)
    n_hb = ho // th
    tm = th * wo

    kern1 = functools.partial(_conv_stats_kernel, k=k, d=d, th=th, wo=wo)
    y3, csum, cssq = pl.pallas_call(
        kern1,
        out_shape=(
            jax.ShapeDtypeStruct((n_b, nout, s_sp), jnp.float32),
            jax.ShapeDtypeStruct((1, nout), jnp.float32),
            jax.ShapeDtypeStruct((1, nout), jnp.float32),
        ),
        grid=(n_b, n_hb),
        in_specs=[
            pl.BlockSpec((1, hp, wp, cin), lambda n, j: (n, 0, 0, 0)),
            pl.BlockSpec((k * k, cin, nout), lambda n, j: (0, 0, 0)),
        ],
        out_specs=(
            pl.BlockSpec((1, nout, tm), lambda n, j: (n, 0, j)),
            pl.BlockSpec((1, nout), lambda n, j: (0, 0)),
            pl.BlockSpec((1, nout), lambda n, j: (0, 0)),
        ),
        compiler_params=pltpu.CompilerParams(
            dimension_semantics=("arbitrary", "arbitrary"),   # stats accumulator is revisited
            vmem_limit_bytes=32 * 1024 * 1024),
    )(xp, w_taps)

    # Tiny per-channel BatchNorm epilogue coefficients (plain JAX, negligible work).
    m_total = jnp.float32(n_b * s_sp)
    mean = csum[0] / m_total
    var = jnp.maximum(cssq[0] / m_total - mean * mean, 0.0)
    scale = gamma.astype(jnp.float32) * lax.rsqrt(var + _BN_EPS)
    shift = beta.astype(jnp.float32) - mean * scale

    ts = _pick_spatial_tile(s_sp)
    out3 = pl.pallas_call(
        _bn_prelu_kernel,
        out_shape=jax.ShapeDtypeStruct((n_b, nout, s_sp), jnp.float32),
        grid=(n_b, s_sp // ts),
        in_specs=[
            pl.BlockSpec((1, nout, ts), lambda n, j: (n, 0, j)),
            pl.BlockSpec((nout, 1), lambda n, j: (0, 0)),
            pl.BlockSpec((nout, 1), lambda n, j: (0, 0)),
            pl.BlockSpec(memory_space=pltpu.MemorySpace.SMEM),
        ],
        out_specs=pl.BlockSpec((1, nout, ts), lambda n, j: (n, 0, j)),
        compiler_params=pltpu.CompilerParams(
            dimension_semantics=("parallel", "parallel"),
            vmem_limit_bytes=32 * 1024 * 1024),
    )(y3, scale.reshape(nout, 1), shift.reshape(nout, 1),
      jnp.asarray(alpha, jnp.float32).reshape(1))

    # (N, nOut, Ho*Wo) -> NCHW is a pure metadata reshape (no output transpose).
    return out3.reshape(n_b, nout, ho, wo)


def _reference_forward(x, weight, bias, gamma, beta, alpha, k=3, p=1, s=1, d=1):
    """Pure-JAX reference (matches the PyTorch training-mode forward)."""
    y = lax.conv_general_dilated(
        x, weight, window_strides=(s, s), padding=[(p, p), (p, p)],
        rhs_dilation=(d, d), dimension_numbers=("NCHW", "OIHW", "NCHW"))
    y = y + bias.reshape(1, -1, 1, 1)
    mean = jnp.mean(y, axis=(0, 2, 3), keepdims=True)
    var = jnp.mean((y - mean) ** 2, axis=(0, 2, 3), keepdims=True)
    z = (y - mean) / jnp.sqrt(var + _BN_EPS)
    z = z * gamma.reshape(1, -1, 1, 1) + beta.reshape(1, -1, 1, 1)
    return jnp.where(z > 0, z, alpha * z)


if __name__ == "__main__":
    # Small shapes consistent with the module: N=2, nIn=4, H=W=16, nOut=8, k=3, p=1, s=1, d=1
    N, nIn, H, W, nOut, k, p, s, d = 2, 4, 16, 16, 8, 3, 1, 1, 1

    key = jax.random.PRNGKey(0)
    kx, kw, kb, kg, kbe = jax.random.split(key, 5)
    x = jax.random.normal(kx, (N, nIn, H, W), dtype=jnp.float32)
    weight = jax.random.normal(kw, (nOut, nIn, k, k), dtype=jnp.float32) * 0.1
    bias = jax.random.normal(kb, (nOut,), dtype=jnp.float32) * 0.1   # cancelled by BN (validated below)
    gamma = 1.0 + 0.1 * jax.random.normal(kg, (nOut,), dtype=jnp.float32)
    beta = 0.1 * jax.random.normal(kbe, (nOut,), dtype=jnp.float32)
    alpha = jnp.float32(0.25)                                        # PReLU default init

    # block_h=8 -> pass-1 grid (N, Ho//8) = (2, 2): exercises the tiled stats accumulator.
    out = convlayer_forward(x, weight, bias, gamma, beta, alpha,
                            k=k, p=p, s=s, d=d, block_h=8)
    out = jax.block_until_ready(out)

    ref = _reference_forward(x, weight, bias, gamma, beta, alpha, k=k, p=p, s=s, d=d)
    assert out.shape == (N, nOut, H, W), out.shape
    max_err = float(jnp.max(jnp.abs(out - ref)))
    assert jnp.allclose(out, ref, rtol=2e-3, atol=2e-3), max_err

    print("KERNEL_OK")
</pallas_src>

<mosaic_0001>
module attributes {stable_mosaic.version = 11 : i64} {
  func.func @_conv_stats_kernel(%arg0: i32, %arg1: i32, %arg2: memref<1x18x18x4xf32, #tpu.memory_space<vmem>>, %arg3: memref<9x4x8xf32, #tpu.memory_space<vmem>>, %arg4: memref<1x8x128xf32, #tpu.memory_space<vmem>>, %arg5: memref<1x8xf32, #tpu.memory_space<vmem>>, %arg6: memref<1x8xf32, #tpu.memory_space<vmem>>) attributes {dimension_semantics = [#tpu.dimension_semantics<arbitrary>, #tpu.dimension_semantics<arbitrary>], iteration_bounds = array<i64: 2, 2>, scalar_prefetch = 0 : i64, scratch_operands = 0 : i64, tpu.core_type = #tpu.core_type<tc>, window_params = [{transform_indices = @transform_0, window_bounds = array<i64: 1, 18, 18, 4>}, {pipeline_mode = #tpu.pipeline_mode<synchronous>, transform_indices = @transform_1, window_bounds = array<i64: 9, 4, 8>}, {transform_indices = @transform_2, window_bounds = array<i64: 1, 8, 128>}, {pipeline_mode = #tpu.pipeline_mode<synchronous>, transform_indices = @transform_3, window_bounds = array<i64: 1, 8>}, {pipeline_mode = #tpu.pipeline_mode<synchronous>, transform_indices = @transform_4, window_bounds = array<i64: 1, 8>}]} {
    %c0_i32 = arith.constant 0 : i32
    %0 = arith.cmpi eq, %arg0, %c0_i32 : i32
    %c0_i32_0 = arith.constant 0 : i32
    %1 = arith.cmpi eq, %arg1, %c0_i32_0 : i32
    %2 = arith.andi %0, %1 : i1
    %3 = arith.extui %2 : i1 to i32
    %c0_i32_1 = arith.constant 0 : i32
    %4 = arith.cmpi ne, %3, %c0_i32_1 : i32
    scf.if %4 {
      %cst_76 = arith.constant 0.000000e+00 : f32
      %103 = vector.broadcast %cst_76 : f32 to vector<1x8xf32>
      %c0_77 = arith.constant 0 : index
      %c0_78 = arith.constant 0 : index
      %104 = vector.load %arg5[%c0_77, %c0_78] : memref<1x8xf32, #tpu.memory_space<vmem>>, vector<1x8xf32>
      tpu.vector_store %arg5[%c0_77, %c0_78], %103 {strides = array<i32>} : memref<1x8xf32, #tpu.memory_space<vmem>>, vector<1x8xf32>,
      %cst_79 = arith.constant 0.000000e+00 : f32
      %105 = vector.broadcast %cst_79 : f32 to vector<1x8xf32>
      %c0_80 = arith.constant 0 : index
      %c0_81 = arith.constant 0 : index
      %106 = vector.load %arg6[%c0_80, %c0_81] : memref<1x8xf32, #tpu.memory_space<vmem>>, vector<1x8xf32>
      tpu.vector_store %arg6[%c0_80, %c0_81], %105 {strides = array<i32>} : memref<1x8xf32, #tpu.memory_space<vmem>>, vector<1x8xf32>,
    } else {
    }
    %c8_i32 = arith.constant 8 : i32
    %5 = arith.muli %arg1, %c8_i32 : i32
    %cst = arith.constant 0.000000e+00 : f32
    %6 = vector.broadcast %cst : f32 to vector<128x8xf32>
    %c0_i32_2 = arith.constant 0 : i32
    %7 = arith.addi %5, %c0_i32_2 : i32
    %c0 = arith.constant 0 : index
    %8 = arith.index_cast %7 : i32 to index
    %c0_3 = arith.constant 0 : index
    %c0_4 = arith.constant 0 : index
    %9 = vector.load %arg2[%c0, %8, %c0_3, %c0_4] : memref<1x18x18x4xf32, #tpu.memory_space<vmem>>, vector<1x8x16x4xf32>
    %10 = vector.shape_cast %9 : vector<1x8x16x4xf32> to vector<8x16x4xf32>
    %11 = vector.shape_cast %10 : vector<8x16x4xf32> to vector<128x4xf32>
    %c0_5 = arith.constant 0 : index
    %c0_6 = arith.constant 0 : index
    %c0_7 = arith.constant 0 : index
    %12 = vector.load %arg3[%c0_5, %c0_6, %c0_7] : memref<9x4x8xf32, #tpu.memory_space<vmem>>, vector<1x4x8xf32>
    %13 = vector.shape_cast %12 : vector<1x4x8xf32> to vector<4x8xf32>
    %cst_8 = arith.constant dense<0.000000e+00> : vector<128x8xf32>
    %14 = tpu.matmul %11, %13, %cst_8 {dimension_numbers = #tpu.dot_dimension_numbers<[1], [0], [0], [1], [0, 0, 1, 1], [], []>} : vector<128x4xf32>, vector<4x8xf32>, vector<128x8xf32> -> vector<128x8xf32>
    %15 = arith.addf %6, %14 : vector<128x8xf32>
    %c0_i32_9 = arith.constant 0 : i32
    %16 = arith.addi %5, %c0_i32_9 : i32
    %c0_10 = arith.constant 0 : index
    %17 = arith.index_cast %16 : i32 to index
    %c1 = arith.constant 1 : index
    %c0_11 = arith.constant 0 : index
    %18 = vector.load %arg2[%c0_10, %17, %c1, %c0_11] : memref<1x18x18x4xf32, #tpu.memory_space<vmem>>, vector<1x8x16x4xf32>
    %19 = vector.shape_cast %18 : vector<1x8x16x4xf32> to vector<8x16x4xf32>
    %20 = vector.shape_cast %19 : vector<8x16x4xf32> to vector<128x4xf32>
    %c1_12 = arith.constant 1 : index
    %c0_13 = arith.constant 0 : index
    %c0_14 = arith.constant 0 : index
    %21 = vector.load %arg3[%c1_12, %c0_13, %c0_14] : memref<9x4x8xf32, #tpu.memory_space<vmem>>, vector<1x4x8xf32>
    %22 = vector.shape_cast %21 : vector<1x4x8xf32> to vector<4x8xf32>
    %cst_15 = arith.constant dense<0.000000e+00> : vector<128x8xf32>
    %23 = tpu.matmul %20, %22, %cst_15 {dimension_numbers = #tpu.dot_dimension_numbers<[1], [0], [0], [1], [0, 0, 1, 1], [], []>} : vector<128x4xf32>, vector<4x8xf32>, vector<128x8xf32> -> vector<128x8xf32>
    %24 = arith.addf %15, %23 : vector<128x8xf32>
    %c0_i32_16 = arith.constant 0 : i32
    %25 = arith.addi %5, %c0_i32_16 : i32
    %c0_17 = arith.constant 0 : index
    %26 = arith.index_cast %25 : i32 to index
    %c2 = arith.constant 2 : index
    %c0_18 = arith.constant 0 : index
    %27 = vector.load %arg2[%c0_17, %26, %c2, %c0_18] : memref<1x18x18x4xf32, #tpu.memory_space<vmem>>, vector<1x8x16x4xf32>
    %28 = vector.shape_cast %27 : vector<1x8x16x4xf32> to vector<8x16x4xf32>
    %29 = vector.shape_cast %28 : vector<8x16x4xf32> to vector<128x4xf32>
    %c2_19 = arith.constant 2 : index
    %c0_20 = arith.constant 0 : index
    %c0_21 = arith.constant 0 : index
    %30 = vector.load %arg3[%c2_19, %c0_20, %c0_21] : memref<9x4x8xf32, #tpu.memory_space<vmem>>, vector<1x4x8xf32>
    %31 = vector.shape_cast %30 : vector<1x4x8xf32> to vector<4x8xf32>
    %cst_22 = arith.constant dense<0.000000e+00> : vector<128x8xf32>
    %32 = tpu.matmul %29, %31, %cst_22 {dimension_numbers = #tpu.dot_dimension_numbers<[1], [0], [0], [1], [0, 0, 1, 1], [], []>} : vector<128x4xf32>, vector<4x8xf32>, vector<128x8xf32> -> vector<128x8xf32>
    %33 = arith.addf %24, %32 : vector<128x8xf32>
    %c1_i32 = arith.constant 1 : i32
    %34 = arith.addi %5, %c1_i32 : i32
    %c0_23 = arith.constant 0 : index
    %35 = arith.index_cast %34 : i32 to index
    %c0_24 = arith.constant 0 : index
    %c0_25 = arith.constant 0 : index
    %36 = vector.load %arg2[%c0_23, %35, %c0_24, %c0_25] : memref<1x18x18x4xf32, #tpu.memory_space<vmem>>, vector<1x8x16x4xf32>
    %37 = vector.shape_cast %36 : vector<1x8x16x4xf32> to vector<8x16x4xf32>
    %38 = vector.shape_cast %37 : vector<8x16x4xf32> to vector<128x4xf32>
    %c3 = arith.constant 3 : index
    %c0_26 = arith.constant 0 : index
    %c0_27 = arith.constant 0 : index
    %39 = vector.load %arg3[%c3, %c0_26, %c0_27] : memref<9x4x8xf32, #tpu.memory_space<vmem>>, vector<1x4x8xf32>
    %40 = vector.shape_cast %39 : vector<1x4x8xf32> to vector<4x8xf32>
    %cst_28 = arith.constant dense<0.000000e+00> : vector<128x8xf32>
    %41 = tpu.matmul %38, %40, %cst_28 {dimension_numbers = #tpu.dot_dimension_numbers<[1], [0], [0], [1], [0, 0, 1, 1], [], []>} : vector<128x4xf32>, vector<4x8xf32>, vector<128x8xf32> -> vector<128x8xf32>
    %42 = arith.addf %33, %41 : vector<128x8xf32>
    %c1_i32_29 = arith.constant 1 : i32
    %43 = arith.addi %5, %c1_i32_29 : i32
    %c0_30 = arith.constant 0 : index
    %44 = arith.index_cast %43 : i32 to index
    %c1_31 = arith.constant 1 : index
    %c0_32 = arith.constant 0 : index
    %45 = vector.load %arg2[%c0_30, %44, %c1_31, %c0_32] : memref<1x18x18x4xf32, #tpu.memory_space<vmem>>, vector<1x8x16x4xf32>
    %46 = vector.shape_cast %45 : vector<1x8x16x4xf32> to vector<8x16x4xf32>
    %47 = vector.shape_cast %46 : vector<8x16x4xf32> to vector<128x4xf32>
    %c4 = arith.constant 4 : index
    %c0_33 = arith.constant 0 : index
    %c0_34 = arith.constant 0 : index
    %48 = vector.load %arg3[%c4, %c0_33, %c0_34] : memref<9x4x8xf32, #tpu.memory_space<vmem>>, vector<1x4x8xf32>
    %49 = vector.shape_cast %48 : vector<1x4x8xf32> to vector<4x8xf32>
    %cst_35 = arith.constant dense<0.000000e+00> : vector<128x8xf32>
    %50 = tpu.matmul %47, %49, %cst_35 {dimension_numbers = #tpu.dot_dimension_numbers<[1], [0], [0], [1], [0, 0, 1, 1], [], []>} : vector<128x4xf32>, vector<4x8xf32>, vector<128x8xf32> -> vector<128x8xf32>
    %51 = arith.addf %42, %50 : vector<128x8xf32>
    %c1_i32_36 = arith.constant 1 : i32
    %52 = arith.addi %5, %c1_i32_36 : i32
    %c0_37 = arith.constant 0 : index
    %53 = arith.index_cast %52 : i32 to index
    %c2_38 = arith.constant 2 : index
    %c0_39 = arith.constant 0 : index
    %54 = vector.load %arg2[%c0_37, %53, %c2_38, %c0_39] : memref<1x18x18x4xf32, #tpu.memory_space<vmem>>, vector<1x8x16x4xf32>
    %55 = vector.shape_cast %54 : vector<1x8x16x4xf32> to vector<8x16x4xf32>
    %56 = vector.shape_cast %55 : vector<8x16x4xf32> to vector<128x4xf32>
    %c5 = arith.constant 5 : index
    %c0_40 = arith.constant 0 : index
    %c0_41 = arith.constant 0 : index
    %57 = vector.load %arg3[%c5, %c0_40, %c0_41] : memref<9x4x8xf32, #tpu.memory_space<vmem>>, vector<1x4x8xf32>
    %58 = vector.shape_cast %57 : vector<1x4x8xf32> to vector<4x8xf32>
    %cst_42 = arith.constant dense<0.000000e+00> : vector<128x8xf32>
    %59 = tpu.matmul %56, %58, %cst_42 {dimension_numbers = #tpu.dot_dimension_numbers<[1], [0], [0], [1], [0, 0, 1, 1], [], []>} : vector<128x4xf32>, vector<4x8xf32>, vector<128x8xf32> -> vector<128x8xf32>
    %60 = arith.addf %51, %59 : vector<128x8xf32>
    %c2_i32 = arith.constant 2 : i32
    %61 = arith.addi %5, %c2_i32 : i32
    %c0_43 = arith.constant 0 : index
    %62 = arith.index_cast %61 : i32 to index
    %c0_44 = arith.constant 0 : index
    %c0_45 = arith.constant 0 : index
    %63 = vector.load %arg2[%c0_43, %62, %c0_44, %c0_45] : memref<1x18x18x4xf32, #tpu.memory_space<vmem>>, vector<1x8x16x4xf32>
    %64 = vector.shape_cast %63 : vector<1x8x16x4xf32> to vector<8x16x4xf32>
    %65 = vector.shape_cast %64 : vector<8x16x4xf32> to vector<128x4xf32>
    %c6 = arith.constant 6 : index
    %c0_46 = arith.constant 0 : index
    %c0_47 = arith.constant 0 : index
    %66 = vector.load %arg3[%c6, %c0_46, %c0_47] : memref<9x4x8xf32, #tpu.memory_space<vmem>>, vector<1x4x8xf32>
    %67 = vector.shape_cast %66 : vector<1x4x8xf32> to vector<4x8xf32>
    %cst_48 = arith.constant dense<0.000000e+00> : vector<128x8xf32>
    %68 = tpu.matmul %65, %67, %cst_48 {dimension_numbers = #tpu.dot_dimension_numbers<[1], [0], [0], [1], [0, 0, 1, 1], [], []>} : vector<128x4xf32>, vector<4x8xf32>, vector<128x8xf32> -> vector<128x8xf32>
    %69 = arith.addf %60, %68 : vector<128x8xf32>
    %c2_i32_49 = arith.constant 2 : i32
    %70 = arith.addi %5, %c2_i32_49 : i32
    %c0_50 = arith.constant 0 : index
    %71 = arith.index_cast %70 : i32 to index
    %c1_51 = arith.constant 1 : index
    %c0_52 = arith.constant 0 : index
    %72 = vector.load %arg2[%c0_50, %71, %c1_51, %c0_52] : memref<1x18x18x4xf32, #tpu.memory_space<vmem>>, vector<1x8x16x4xf32>
    %73 = vector.shape_cast %72 : vector<1x8x16x4xf32> to vector<8x16x4xf32>
    %74 = vector.shape_cast %73 : vector<8x16x4xf32> to vector<128x4xf32>
    %c7 = arith.constant 7 : index
    %c0_53 = arith.constant 0 : index
    %c0_54 = arith.constant 0 : index
    %75 = vector.load %arg3[%c7, %c0_53, %c0_54] : memref<9x4x8xf32, #tpu.memory_space<vmem>>, vector<1x4x8xf32>
    %76 = vector.shape_cast %75 : vector<1x4x8xf32> to vector<4x8xf32>
    %cst_55 = arith.constant dense<0.000000e+00> : vector<128x8xf32>
    %77 = tpu.matmul %74, %76, %cst_55 {dimension_numbers = #tpu.dot_dimension_numbers<[1], [0], [0], [1], [0, 0, 1, 1], [], []>} : vector<128x4xf32>, vector<4x8xf32>, vector<128x8xf32> -> vector<128x8xf32>
    %78 = arith.addf %69, %77 : vector<128x8xf32>
    %c2_i32_56 = arith.constant 2 : i32
    %79 = arith.addi %5, %c2_i32_56 : i32
    %c0_57 = arith.constant 0 : index
    %80 = arith.index_cast %79 : i32 to index
    %c2_58 = arith.constant 2 : index
    %c0_59 = arith.constant 0 : index
    %81 = vector.load %arg2[%c0_57, %80, %c2_58, %c0_59] : memref<1x18x18x4xf32, #tpu.memory_space<vmem>>, vector<1x8x16x4xf32>
    %82 = vector.shape_cast %81 : vector<1x8x16x4xf32> to vector<8x16x4xf32>
    %83 = vector.shape_cast %82 : vector<8x16x4xf32> to vector<128x4xf32>
    %c8 = arith.constant 8 : index
    %c0_60 = arith.constant 0 : index
    %c0_61 = arith.constant 0 : index
    %84 = vector.load %arg3[%c8, %c0_60, %c0_61] : memref<9x4x8xf32, #tpu.memory_space<vmem>>, vector<1x4x8xf32>
    %85 = vector.shape_cast %84 : vector<1x4x8xf32> to vector<4x8xf32>
    %cst_62 = arith.constant dense<0.000000e+00> : vector<128x8xf32>
    %86 = tpu.matmul %83, %85, %cst_62 {dimension_numbers = #tpu.dot_dimension_numbers<[1], [0], [0], [1], [0, 0, 1, 1], [], []>} : vector<128x4xf32>, vector<4x8xf32>, vector<128x8xf32> -> vector<128x8xf32>
    %87 = arith.addf %78, %86 : vector<128x8xf32>
    %c0_63 = arith.constant 0 : index
    %c0_64 = arith.constant 0 : index
    %88 = vector.load %arg5[%c0_63, %c0_64] : memref<1x8xf32, #tpu.memory_space<vmem>>, vector<1x8xf32>
    %cst_65 = arith.constant dense<0.000000e+00> : vector<8xf32>
    %89 = vector.multi_reduction <add>, %87, %cst_65 [0] : vector<128x8xf32> to vector<8xf32>
    %90 = vector.shape_cast %89 : vector<8xf32> to vector<1x8xf32>
    %91 = arith.addf %88, %90 : vector<1x8xf32>
    %c0_66 = arith.constant 0 : index
    %c0_67 = arith.constant 0 : index
    %92 = vector.load %arg5[%c0_66, %c0_67] : memref<1x8xf32, #tpu.memory_space<vmem>>, vector<1x8xf32>
    tpu.vector_store %arg5[%c0_66, %c0_67], %91 {strides = array<i32>} : memref<1x8xf32, #tpu.memory_space<vmem>>, vector<1x8xf32>,
    %c0_68 = arith.constant 0 : index
    %c0_69 = arith.constant 0 : index
    %93 = vector.load %arg6[%c0_68, %c0_69] : memref<1x8xf32, #tpu.memory_space<vmem>>, vector<1x8xf32>
    %94 = arith.mulf %87, %87 : vector<128x8xf32>
    %cst_70 = arith.constant dense<0.000000e+00> : vector<8xf32>
    %95 = vector.multi_reduction <add>, %94, %cst_70 [0] : vector<128x8xf32> to vector<8xf32>
    %96 = vector.shape_cast %95 : vector<8xf32> to vector<1x8xf32>
    %97 = arith.addf %93, %96 : vector<1x8xf32>
    %c0_71 = arith.constant 0 : index
    %c0_72 = arith.constant 0 : index
    %98 = vector.load %arg6[%c0_71, %c0_72] : memref<1x8xf32, #tpu.memory_space<vmem>>, vector<1x8xf32>
    tpu.vector_store %arg6[%c0_71, %c0_72], %97 {strides = array<i32>} : memref<1x8xf32, #tpu.memory_space<vmem>>, vector<1x8xf32>,
    %99 = tpu.transpose %87, [1, 0] : vector<128x8xf32> -> vector<8x128xf32>
    %c0_73 = arith.constant 0 : index
    %c0_74 = arith.constant 0 : index
    %c0_75 = arith.constant 0 : index
    %100 = vector.load %arg4[%c0_73, %c0_74, %c0_75] : memref<1x8x128xf32, #tpu.memory_space<vmem>>, vector<1x8x128xf32>
    %101 = vector.shape_cast %100 : vector<1x8x128xf32> to vector<8x128xf32>
    %102 = vector.shape_cast %99 : vector<8x128xf32> to vector<1x8x128xf32>
    tpu.vector_store %arg4[%c0_73, %c0_74, %c0_75], %102 {strides = array<i32>} : memref<1x8x128xf32, #tpu.memory_space<vmem>>, vector<1x8x128xf32>,
    return
  }
  func.func @transform_0(%arg0: i32, %arg1: i32) -> (i32, i32, i32, i32) {
    %c0_i32 = arith.constant 0 : i32
    %c0_i32_0 = arith.constant 0 : i32
    %c0_i32_1 = arith.constant 0 : i32
    %c0_i32_2 = arith.constant 0 : i32
    return %arg0, %c0_i32, %c0_i32_0, %c0_i32_1 : i32, i32, i32, i32
  }
  func.func @transform_1(%arg0: i32, %arg1: i32) -> (i32, i32, i32) {
    %c0_i32 = arith.constant 0 : i32
    %c0_i32_0 = arith.constant 0 : i32
    %c0_i32_1 = arith.constant 0 : i32
    %c0_i32_2 = arith.constant 0 : i32
    return %c0_i32, %c0_i32_0, %c0_i32_1 : i32, i32, i32
  }
  func.func @transform_2(%arg0: i32, %arg1: i32) -> (i32, i32, i32) {
    %c0_i32 = arith.constant 0 : i32
    %c0_i32_0 = arith.constant 0 : i32
    return %arg0, %c0_i32, %arg1 : i32, i32, i32
  }
  func.func @transform_3(%arg0: i32, %arg1: i32) -> (i32, i32) {
    %c0_i32 = arith.constant 0 : i32
    %c0_i32_0 = arith.constant 0 : i32
    %c0_i32_1 = arith.constant 0 : i32
    return %c0_i32, %c0_i32_0 : i32, i32
  }
  func.func @transform_4(%arg0: i32, %arg1: i32) -> (i32, i32) {
    %c0_i32 = arith.constant 0 : i32
    %c0_i32_0 = arith.constant 0 : i32
    %c0_i32_1 = arith.constant 0 : i32
    return %c0_i32, %c0_i32_0 : i32, i32
  }
}

module attributes {stable_mosaic.version = 11 : i64} {
  func.func @_bn_prelu_kernel(%arg0: i32, %arg1: i32, %arg2: memref<1x8x256xf32, #tpu.memory_space<vmem>>, %arg3: memref<8x1xf32, #tpu.memory_space<vmem>>, %arg4: memref<8x1xf32, #tpu.memory_space<vmem>>, %arg5: memref<1xf32, #tpu.memory_space<smem>>, %arg6: memref<1x8x256xf32, #tpu.memory_space<vmem>>) attributes {dimension_semantics = [#tpu.dimension_semantics<parallel>, #tpu.dimension_semantics<parallel>], iteration_bounds = array<i64: 2, 1>, scalar_prefetch = 0 : i64, scratch_operands = 0 : i64, tpu.core_type = #tpu.core_type<tc>, window_params = [{transform_indices = @transform_0, window_bounds = array<i64: 1, 8, 256>}, {pipeline_mode = #tpu.pipeline_mode<synchronous>, transform_indices = @transform_1, window_bounds = array<i64: 8, 1>}, {pipeline_mode = #tpu.pipeline_mode<synchronous>, transform_indices = @transform_2, window_bounds = array<i64: 8, 1>}, {transform_indices = @transform_3, window_bounds = array<i64: 1>}, {transform_indices = @transform_4, window_bounds = array<i64: 1, 8, 256>}]} {
    %c0 = arith.constant 0 : index
    %c0_0 = arith.constant 0 : index
    %c0_1 = arith.constant 0 : index
    %0 = vector.load %arg2[%c0, %c0_0, %c0_1] : memref<1x8x256xf32, #tpu.memory_space<vmem>>, vector<1x8x256xf32>
    %1 = vector.shape_cast %0 : vector<1x8x256xf32> to vector<8x256xf32>
    %c0_2 = arith.constant 0 : index
    %c0_3 = arith.constant 0 : index
    %2 = vector.load %arg3[%c0_2, %c0_3] : memref<8x1xf32, #tpu.memory_space<vmem>>, vector<8x1xf32>
    %3 = vector.broadcast %2 : vector<8x1xf32> to vector<8x256xf32>
    %4 = arith.mulf %1, %3 : vector<8x256xf32>
    %c0_4 = arith.constant 0 : index
    %c0_5 = arith.constant 0 : index
    %5 = vector.load %arg4[%c0_4, %c0_5] : memref<8x1xf32, #tpu.memory_space<vmem>>, vector<8x1xf32>
    %6 = vector.broadcast %5 : vector<8x1xf32> to vector<8x256xf32>
    %7 = arith.addf %4, %6 : vector<8x256xf32>
    %c0_6 = arith.constant 0 : index
    %8 = memref.load %arg5[%c0_6] : memref<1xf32, #tpu.memory_space<smem>>
    %cst = arith.constant 0.000000e+00 : f32
    %9 = vector.broadcast %cst : f32 to vector<8x256xf32>
    %10 = arith.cmpf ogt, %7, %9 : vector<8x256xf32>
    %11 = vector.broadcast %8 : f32 to vector<8x256xf32>
    %12 = arith.mulf %11, %7 : vector<8x256xf32>
    %13 = arith.select %10, %7, %12 : vector<8x256xi1>, vector<8x256xf32>
    %c0_7 = arith.constant 0 : index
    %c0_8 = arith.constant 0 : index
    %c0_9 = arith.constant 0 : index
    %14 = vector.load %arg6[%c0_7, %c0_8, %c0_9] : memref<1x8x256xf32, #tpu.memory_space<vmem>>, vector<1x8x256xf32>
    %15 = vector.shape_cast %14 : vector<1x8x256xf32> to vector<8x256xf32>
    %16 = vector.shape_cast %13 : vector<8x256xf32> to vector<1x8x256xf32>
    tpu.vector_store %arg6[%c0_7, %c0_8, %c0_9], %16 {strides = array<i32>} : memref<1x8x256xf32, #tpu.memory_space<vmem>>, vector<1x8x256xf32>,
    return
  }
  func.func @transform_0(%arg0: i32, %arg1: i32) -> (i32, i32, i32) {
    %c0_i32 = arith.constant 0 : i32
    %c0_i32_0 = arith.constant 0 : i32
    return %arg0, %c0_i32, %arg1 : i32, i32, i32
  }
  func.func @transform_1(%arg0: i32, %arg1: i32) -> (i32, i32) {
    %c0_i32 = arith.constant 0 : i32
    %c0_i32_0 = arith.constant 0 : i32
    %c0_i32_1 = arith.constant 0 : i32
    return %c0_i32, %c0_i32_0 : i32, i32
  }
  func.func @transform_2(%arg0: i32, %arg1: i32) -> (i32, i32) {
    %c0_i32 = arith.constant 0 : i32
    %c0_i32_0 = arith.constant 0 : i32
    %c0_i32_1 = arith.constant 0 : i32
    return %c0_i32, %c0_i32_0 : i32, i32
  }
  func.func @transform_3(%arg0: i32, %arg1: i32) -> i32 {
    %c0_i32 = arith.constant 0 : i32
    %c0_i32_0 = arith.constant 0 : i32
    return %c0_i32 : i32
  }
  func.func @transform_4(%arg0: i32, %arg1: i32) -> (i32, i32, i32) {
    %c0_i32 = arith.constant 0 : i32
    %c0_i32_0 = arith.constant 0 : i32
    return %arg0, %c0_i32, %arg1 : i32, i32, i32
  }
}

</mosaic_0001>

<bundles_post_ra>
// kernel: convlayer_forward.3
= control target key start
LH: loop header
LB: loop body
LE: loop exit
PB: predicated region body
PF: predicated region fallthrough
CT: control target
= control target key end

     0   :  { %s445_s17 = smov 0   ;;  %s447_s18 = smov 0   ;;  %s484_s0 = inlined_call_operand.vmem [shape: f32[2,8,256], index: 0, kind: input, shape index: {}]   ;;  %s485_s1 = inlined_call_operand.vmem [shape: f32[8,1], index: 1, kind: input, shape index: {}]   ;;  %s486_s2 = inlined_call_operand.vmem [shape: f32[8,1], index: 2, kind: input, shape index: {}]   ;;  %s487_s3 = inlined_call_operand.<no memory space> [shape: f32[1], index: 3, kind: input, shape index: {}]   ;;  %s488_s4 = inlined_call_operand.vmem [shape: f32[2,8,256], index: 4, kind: output, shape index: {}]  }
   0x1   :  { %9 = sst [smem:[#allocation2]] %s487_s3  ;;  %s449_s19 = smov 0  }
   0x2 LB: > { %s27_s3 = sadd.s32 1, %s410_s18  ;;  %p357_p0 = scmp.ge.s32.totalorder %s414_s19, 1  ;;  %s414_s19 = sphi %s449_s19, %s15_s19   ;;  %s410_s18 = sphi %s447_s18, %s490_s18   ;;  %s406_s17 = sphi %s445_s17, %s489_s17  }
   0x3   : > { %p29_p1 = scmp.ge.s32.totalorder %s27_s3, 2  ;;  %p184_p2 = scmp.lt.s32.totalorder %s414_s19, 3 }
   0x5   : > { %s492_s3 = smov (%p29_p1, %s27_s3), 0  ;;  %p185_p3 = pnand %p357_p0, %p184_p2 }
   0x6   : > { %p219_p4 = scmp.lt.s32.totalorder (!%p185_p3), %s406_s17, 1  ;;  %s256_s25 = sld [smem:[#allocation2]] (!%p185_p3) }
   0x7   : > { %188 = sbr.rel (%p185_p3) target bundleno = 144 (0x90), region = 36 }
   0xc   : > { %v240_v0 = vld [vmem:[%s485_s1] sm:$0xff]  ;;  %v416_v1 = vmov 0   ;;  %s494_s17 = smov (!%p219_p4, %s406_s17), 1  ;;  %v259_v8 = vstv %s256_s25 }
   0xd   : > { %391 = vset.pattern.permute.xlu0 %v416_v1  ;;  %v248_v2 = vld [vmem:[%s486_s2] sm:$0xff]  ;;  %s364_s24 = sshll.u32 %s494_s17, 4 }
   0xe   : > { %243 = vperm.xlu0 %391, %v240_v0   ;;  %s226_s28 = scalar_lea.vmem %s484_s0, %s364_s24  ;;  %s236_s5 = scalar_lea.vmem %s488_s4, %s364_s24 }
   0xf   : > { %v238_v4 = vld [vmem:[%s226_s28] sm:$0xff]  ;;  %v239_v5 = vld [vmem:[%s226_s28 + $0x8] sm:$0xff] }
  0x16   : > { %251 = vperm.xlu0 %391, %v248_v2  }
  0x80   : > { %v244_v3 = vpop.permute.xlu0 %243 }
  0x81   : > { %v246_v6 = vmul.f32 %v244_v3, %v238_v4  ;;  %v247_v7 = vmul.f32 %v244_v3, %v239_v5 }
  0x88   : > { %v252_v9 = vpop.permute.xlu0 %251 }
  0x89   : > { %v254_v10 = vadd.f32 %v252_v9, %v246_v6  ;;  %v255_v11 = vadd.f32 %v252_v9, %v247_v7 }
  0x8b   : > { %vm257_vm0 = vcmp.gt.f32.partialorder %v254_v10, 0.0  ;;  %vm258_vm1 = vcmp.gt.f32.partialorder %v255_v11, 0.0  ;;  %v260_v12 = vmul.f32 %v259_v8, %v254_v10  ;;  %v261_v13 = vmul.f32 %v259_v8, %v255_v11 }
  0x8d   : > { %v262_v14 = vsel %vm257_vm0, %v254_v10, %v260_v12  ;;  %v263_v15 = vsel %vm258_vm1, %v255_v11, %v261_v13 }
  0x8e   : > { %264 = vst [vmem:[%s236_s5] sm:$0xff] %v262_v14 }
  0x8f   : > { %265 = vst [vmem:[%s236_s5 + $0x8] sm:$0xff] %v263_v15 }
  0x90 PF: > { %s15_s19 = sadd.s32 1, %s414_s19   ;;  %s489_s17 = smov %s410_s18 }
  0x91   : > { %p12_p5 = scmp.ge.s32.totalorder %s15_s19, 4   ;;  %s490_s18 = smov %s492_s3 }
  0x93   :  { %14 = sbr.rel (!%p12_p5) target bundleno = 2 (0x2), region = 66 }

// kernel: convlayer_forward.2
= control target key start
LH: loop header
LB: loop body
LE: loop exit
PB: predicated region body
PF: predicated region fallthrough
CT: control target
= control target key end

     0   :  { %s2167_s15 = smov 0   ;;  %s2169_s16 = smov 0   ;;  %s2810_s0 = inlined_call_operand.vmem [shape: f32[2,18,18,4], index: 0, kind: input, shape index: {}]   ;;  %s2811_s1 = inlined_call_operand.vmem [shape: f32[9,4,8], index: 1, kind: input, shape index: {}]   ;;  %s2812_s2 = inlined_call_operand.vmem [shape: f32[2,8,256], index: 2, kind: output, shape index: {0}]   ;;  %s2813_s3 = inlined_call_operand.vmem [shape: f32[1,8], index: 3, kind: output, shape index: {1}]   ;;  %s2814_s4 = inlined_call_operand.vmem [shape: f32[1,8], index: 4, kind: output, shape index: {2}]  }
   0x1   :  { %s2171_s17 = smov 0   ;;  %s2173_s18 = smov 0  }
   0x2   :  { %s2175_s19 = smov 0  }
   0x3 LB: > { %s24_s20 = sadd.s32 1, %s2131_s17  ;;  %s27_s21 = sadd.s32 1, %s2135_s18  ;;  %s2139_s19 = sphi %s2175_s19, %s15_s19   ;;  %s2135_s18 = sphi %s2173_s18, %s2827_s18   ;;  %s2131_s17 = sphi %s2171_s17, %s2826_s17   ;;  %s2127_s16 = sphi %s2169_s16, %s2825_s16   ;;  %s2123_s15 = sphi %s2167_s15, %s2824_s15  }
   0x4   : > { %p25_p0 = scmp.ge.s32.totalorder %s24_s20, 2  ;;  %p1787_p1 = scmp.ge.s32.totalorder %s2139_s19, 1 }
   0x5   : > { %p171_p2 = scmp.lt.s32.totalorder %s2139_s19, 5 }
   0x6   : > { %s2829_s20 = smov (%p25_p0, %s24_s20), 0  ;;  %s2831_s21 = smov (!%p25_p0, %s27_s21), %s2135_s18 }
   0x7   : > { %p172_p3 = pnand %p1787_p1, %p171_p2  ;;  %p29_p4 = scmp.ge.s32.totalorder %s2831_s21, 2 }
   0x9   : > { %s2833_s21 = smov (%p29_p4, %s2831_s21), 0  ;;  %175 = sbr.rel (%p172_p3) target bundleno = 498 (0x1f2), region = 28 }
   0xe   : > { %p200_p5 = scmp.lt.s32.totalorder %s2127_s16, 1  ;;  %p207_p6 = scmp.lt.s32.totalorder %s2123_s15, 1 }
   0xf   : > { %p213_p7 = scmp.eq.s32.totalorder %s2127_s16, 0  ;;  %p214_p8 = scmp.eq.s32.totalorder %s2123_s15, 0 }
  0x10   : > { %s2835_s16 = smov (!%p200_p5, %s2127_s16), 1 }
  0x11   : > { %s208_s22 = scalar_select %p207_p6, %s2123_s15, 1 }
  0x12   : > { %s2059_s23 = smul.u32 432, %s2835_s16  ;;  %s1789_s24 = sshll.u32 %s2835_s16, 1 }
  0x13   : > { %s210_s25 = sadd.s32 %s1789_s24, %s208_s22  ;;  %p215_p9 = pnand %p214_p8, %p213_p7 }
  0x14   : > { %s204_s28 = scalar_lea.vmem %s2810_s0, %s2059_s23  ;;  %s1790_s29 = sshll.u32 %s210_s25, 3 }
  0x15   : > { %s2208_s6 = scalar_lea.vmem %s2812_s2, %s1790_s29  ;;  %218 = sbr.rel (%p215_p9) target bundleno = 29 (0x1d), region = 32 }
  0x1a   : > { %vm219_vm0 = vcmask 57344   ;;  %v2141_v0 = vmov 0.0  }
  0x1b   : > { %220 = vst.msk [vmem:[%s2813_s3] sm:$0x1] %vm219_vm0, %v2141_v0 }
  0x1c   : > { %221 = vst.msk [vmem:[%s2814_s4] sm:$0x1] %vm219_vm0, %v2141_v0 }
  0x1d PF: > { %v1793_v1 = vld [vmem:[%s2811_s1 + $0x4] sm:$0xf]  ;;  %vm309_vm1 = vcmask 1043456   ;;  %s1792_s13 = smul.u32 192, %s2123_s15  ;;  %vm260_vm2 = vcmask 31744   ;;  %vm1551_vm3 = vcmask 64512  }
  0x1e   : > { %2056 = vmatpush.msk.msra.mxu1 %vm309_vm1, %v1793_v1  ;;  %2057 = vmatpush.msk.msra.mxu2 %vm309_vm1, %v1793_v1  ;;  %v1828_v2 = vld [vmem:[%s2811_s1 + $0x8] sm:$0xf]  ;;  %v1864_v3 = vld [vmem:[%s2811_s1 + $0xc] sm:$0xf]  ;;  %v241_v4 = vld [vmem:[%s2811_s1] sm:$0xf] }
  0x1f   : > { %s2231_s26 = scalar_lea.vmem %s204_s28, %s1792_s13  ;;  %2058 = vmatpush.msk.msra.mxu3 %vm309_vm1, %v1793_v1  ;;  %v1898_v9 = vld [vmem:[%s2811_s1 + $0x10] sm:$0xf]  ;;  %1794 = vmatpush.msk.msra.mxu0 %vm309_vm1, %v1793_v1  ;;  %v1968_v10 = vld [vmem:[%s2811_s1 + $0x18] sm:$0xf]  ;;  %v2002_v13 = vld [vmem:[%s2811_s1 + $0x1c] sm:$0xf] }
  0x20   : > { %1829 = vmatpush.msk.msrb.mxu2 %vm309_vm1, %v1828_v2  ;;  %v2236_v5 = vld [vmem:[%s2231_s26 + $0x31] sm:$0xff]  ;;  %v2239_v6 = vld [vmem:[%s2231_s26 + $0x61] sm:$0xff]  ;;  %1811 = vmatpush.msk.msrb.mxu1 %vm309_vm1, %v241_v4  ;;  %v2263_v11 = vld [vmem:[%s2231_s26 + $0x39] sm:$0xff]  ;;  %vm1590_vm4 = vcmask 57344  }
  0x21   : > { %v2242_v7 = vld [vmem:[%s2231_s26 + $0x91] sm:$0xff]  ;;  %1865 = vmatpush.msk.msrb.mxu3 %vm309_vm1, %v1864_v3  ;;  %1799 = vmatmul.msk.f32.vlgmr.msra.gmra.mxu1 %vm260_vm2, %v2236_v5  ;;  %v242_v8 = vld [vmem:[%s2231_s26 + $0x1] sm:$0xff]  ;;  %v2266_v12 = vld [vmem:[%s2231_s26 + $0x69] sm:$0xff] }
  0x22   : > { %1803 = vmatmul.msk.f32.vlgmr.msra.gmra.mxu2 %vm260_vm2, %v2239_v6  ;;  %1807 = vmatmul.msk.f32.vlgmr.msra.gmra.mxu3 %vm260_vm2, %v2242_v7  ;;  %v2273_v14 = vld [vmem:[%s2231_s26 + $0x99] sm:$0xff]  ;;  %v1932_v15 = vld [vmem:[%s2811_s1 + $0x14] sm:$0xf]  ;;  %v243_v16 = vld [vmem:[%s2231_s26 + $0x9] sm:$0xff] }
  0x23   : > { %1795 = vmatmul.msk.f32.vlgmr.msra.gmra.mxu0 %vm260_vm2, %v242_v8  ;;  %1969 = vmatpush.msk.msra.mxu2 %vm309_vm1, %v1968_v10  ;;  %v2036_v17 = vld [vmem:[%s2811_s1 + $0x20] sm:$0xf]  ;;  %v2293_v18 = vld [vmem:[%s2231_s26 + $0x49] sm:$0xff]  ;;  %v2310_v22 = vld [vmem:[%s2231_s26 + $0x51] sm:$0xff] }
  0x24   : > { %1899 = vmatpush.msk.msrb.mxu0 %vm309_vm1, %v1898_v9  ;;  %2003 = vmatpush.msk.msra.mxu3 %vm309_vm1, %v2002_v13  ;;  %v2296_v19 = vld [vmem:[%s2231_s26 + $0x79] sm:$0xff]  ;;  %v2299_v20 = vld [vmem:[%s2231_s26 + $0xa9] sm:$0xff]  ;;  %v2313_v23 = vld [vmem:[%s2231_s26 + $0x81] sm:$0xff] }
  0x25   : > { %1933 = vmatpush.msk.msra.mxu1 %vm309_vm1, %v1932_v15  ;;  %v244_v21 = vld [vmem:[%s2231_s26 + $0x19] sm:$0xff]  ;;  %v2316_v24 = vld [vmem:[%s2231_s26 + $0xb1] sm:$0xff]  ;;  %v245_v25 = vld [vmem:[%s2231_s26 + $0x21] sm:$0xff] }
  0x26   : > { %2037 = vmatpush.msk.msra.mxu0 %vm309_vm1, %v2036_v17  ;;  %v225_v26 = vld [vmem:[%s2231_s26] sm:$0xff]  ;;  %v1848_v28 = vld [vmem:[%s2231_s26 + $0x18] sm:$0xff]  ;;  %v226_v29 = vld [vmem:[%s2231_s26 + $0x8] sm:$0xff] }
  0x27   : > { %v494_v27 = vld [vmem:[%s2231_s26 + $0x2] sm:$0xff]  ;;  %v495_v30 = vld [vmem:[%s2231_s26 + $0xa] sm:$0xff]  ;;  %v2341_v32 = vld [vmem:[%s2231_s26 + $0x1a] sm:$0xff] }
  0x28   : > { %v1849_v31 = vld [vmem:[%s2231_s26 + $0x20] sm:$0xff]  ;;  %v2344_v33 = vld [vmem:[%s2231_s26 + $0x30] sm:$0xff]  ;;  %v2357_v35 = vld [vmem:[%s2231_s26 + $0x38] sm:$0xff] }
  0x29   : > { %1800 = vmatmul.msk.f32.gmra.mxu1 %vm260_vm2, %v2263_v11  ;;  %v2354_v34 = vld [vmem:[%s2231_s26 + $0x22] sm:$0xff]  ;;  %v2367_v36 = vld [vmem:[%s2231_s26 + $0x32] sm:$0xff]  ;;  %v2381_v38 = vld [vmem:[%s2231_s26 + $0x3a] sm:$0xff] }
  0x2a   : > { %1804 = vmatmul.msk.f32.gmra.mxu2 %vm260_vm2, %v2266_v12  ;;  %1808 = vmatmul.msk.f32.gmra.mxu3 %vm260_vm2, %v2273_v14  ;;  %v2370_v37 = vld [vmem:[%s2231_s26 + $0x48] sm:$0xff]  ;;  %v2384_v39 = vld [vmem:[%s2231_s26 + $0x50] sm:$0xff]  ;;  %v2398_v41 = vld [vmem:[%s2231_s26 + $0x60] sm:$0xff] }
  0x2b   : > { %1796 = vmatmul.msk.f32.gmra.mxu0 %vm260_vm2, %v243_v16  ;;  %v2395_v40 = vld [vmem:[%s2231_s26 + $0x4a] sm:$0xff]  ;;  %v2409_v42 = vld [vmem:[%s2231_s26 + $0x52] sm:$0xff]  ;;  %v2423_v44 = vld [vmem:[%s2231_s26 + $0x62] sm:$0xff] }
  0x2c   : > { %v2412_v43 = vld [vmem:[%s2231_s26 + $0x68] sm:$0xff]  ;;  %v2426_v45 = vld [vmem:[%s2231_s26 + $0x78] sm:$0xff]  ;;  %v2440_v47 = vld [vmem:[%s2231_s26 + $0x80] sm:$0xff] }
  0x2d   : > { %v2437_v46 = vld [vmem:[%s2231_s26 + $0x6a] sm:$0xff]  ;;  %v2451_v48 = vld [vmem:[%s2231_s26 + $0x7a] sm:$0xff]  ;;  %v2465_v50 = vld [vmem:[%s2231_s26 + $0x82] sm:$0xff] }
  0x2e   : > { %v2454_v49 = vld [vmem:[%s2231_s26 + $0x90] sm:$0xff]  ;;  %v2468_v51 = vld [vmem:[%s2231_s26 + $0x98] sm:$0xff]  ;;  %v2484_v54 = vld [vmem:[%s2231_s26 + $0xa8] sm:$0xff] }
  0x2f   : > { %v2481_v53 = vld [vmem:[%s2231_s26 + $0x92] sm:$0xff]  ;;  %v2501_v59 = vld [vmem:[%s2231_s26 + $0x9a] sm:$0xff]  ;;  %v2521_v1 = vld [vmem:[%s2231_s26 + $0xaa] sm:$0xff] }
  0x30   : > { %v2504_v60 = vld [vmem:[%s2231_s26 + $0xb0] sm:$0xff]  ;;  %v2524_v2 = vld [vmem:[%s2231_s26 + $0xc0] sm:$0xff]  ;;  %v2547_v15 = vld [vmem:[%s2231_s26 + $0xc8] sm:$0xff] }
  0x31   : > { %1801 = vmatmul.msk.f32.gmra.mxu1 %vm260_vm2, %v2293_v18  ;;  %v2527_v4 = vld [vmem:[%s2231_s26 + $0xc1] sm:$0xff]  ;;  %v2544_v13 = vld [vmem:[%s2231_s26 + $0xb2] sm:$0xff]  ;;  %v2550_v17 = vld [vmem:[%s2231_s26 + $0xc9] sm:$0xff] }
  0x32   : > { %1805 = vmatmul.msk.f32.gmra.mxu2 %vm260_vm2, %v2296_v19  ;;  %1809 = vmatmul.msk.f32.gmra.mxu3 %vm260_vm2, %v2299_v20  ;;  %2818 = vst [vmem:[#allocation4_spill] sm:$0xff] %v2550_v17 }
  0x33   : > { %1797 = vmatmul.msk.f32.gmra.mxu0 %vm260_vm2, %v244_v21 }
  0x39   : > { %1802 = vmatmul.msk.f32.gmra.mxu1 %vm260_vm2, %v2310_v22 }
  0x3a   : > { %1806 = vmatmul.msk.f32.gmra.mxu2 %vm260_vm2, %v2313_v23  ;;  %1810 = vmatmul.msk.f32.gmra.mxu3 %vm260_vm2, %v2316_v24 }
  0x3b   : > { %1798 = vmatmul.msk.f32.gmra.mxu0 %vm260_vm2, %v245_v25 }
  0x41   : > { %1812 = vmatmul.msk.f32.vlgmr.msrb.gmra.mxu1 %vm260_vm2, %v225_v26 }
  0x42   : > { %1830 = vmatmul.msk.f32.vlgmr.msrb.gmra.mxu2 %vm260_vm2, %v494_v27  ;;  %1866 = vmatmul.msk.f32.vlgmr.msrb.gmra.mxu3 %vm260_vm2, %v1848_v28 }
  0x43   : > { %1900 = vmatmul.msk.f32.vlgmr.msrb.gmra.mxu0 %vm260_vm2, %v244_v21 }
  0x49   : > { %1813 = vmatmul.msk.f32.gmra.mxu1 %vm260_vm2, %v226_v29 }
  0x4a   : > { %1831 = vmatmul.msk.f32.gmra.mxu2 %vm260_vm2, %v495_v30  ;;  %1867 = vmatmul.msk.f32.gmra.mxu3 %vm260_vm2, %v1849_v31 }
  0x4b   : > { %1901 = vmatmul.msk.f32.gmra.mxu0 %vm260_vm2, %v245_v25 }
  0x51   : > { %1814 = vmatmul.msk.f32.gmra.mxu1 %vm260_vm2, %v1848_v28 }
  0x52   : > { %1832 = vmatmul.msk.f32.gmra.mxu2 %vm260_vm2, %v2341_v32  ;;  %1868 = vmatmul.msk.f32.gmra.mxu3 %vm260_vm2, %v2344_v33 }
  0x53   : > { %1902 = vmatmul.msk.f32.gmra.mxu0 %vm260_vm2, %v2236_v5 }
  0x59   : > { %1815 = vmatmul.msk.f32.gmra.mxu1 %vm260_vm2, %v1849_v31 }
  0x5a   : > { %1833 = vmatmul.msk.f32.gmra.mxu2 %vm260_vm2, %v2354_v34  ;;  %1869 = vmatmul.msk.f32.gmra.mxu3 %vm260_vm2, %v2357_v35 }
  0x5b   : > { %1903 = vmatmul.msk.f32.gmra.mxu0 %vm260_vm2, %v2263_v11 }
  0x61   : > { %1816 = vmatmul.msk.f32.gmra.mxu1 %vm260_vm2, %v2344_v33 }
  0x62   : > { %1834 = vmatmul.msk.f32.gmra.mxu2 %vm260_vm2, %v2367_v36  ;;  %1870 = vmatmul.msk.f32.gmra.mxu3 %vm260_vm2, %v2370_v37 }
  0x63   : > { %1904 = vmatmul.msk.f32.gmra.mxu0 %vm260_vm2, %v2293_v18 }
  0x69   : > { %1817 = vmatmul.msk.f32.gmra.mxu1 %vm260_vm2, %v2357_v35 }
  0x6a   : > { %1835 = vmatmul.msk.f32.gmra.mxu2 %vm260_vm2, %v2381_v38  ;;  %1871 = vmatmul.msk.f32.gmra.mxu3 %vm260_vm2, %v2384_v39 }
  0x6b   : > { %1905 = vmatmul.msk.f32.gmra.mxu0 %vm260_vm2, %v2310_v22 }
  0x71   : > { %1818 = vmatmul.msk.f32.gmra.mxu1 %vm260_vm2, %v2370_v37 }
  0x72   : > { %1836 = vmatmul.msk.f32.gmra.mxu2 %vm260_vm2, %v2395_v40  ;;  %1872 = vmatmul.msk.f32.gmra.mxu3 %vm260_vm2, %v2398_v41 }
  0x73   : > { %1906 = vmatmul.msk.f32.gmra.mxu0 %vm260_vm2, %v2239_v6 }
  0x79   : > { %1819 = vmatmul.msk.f32.gmra.mxu1 %vm260_vm2, %v2384_v39 }
  0x7a   : > { %1837 = vmatmul.msk.f32.gmra.mxu2 %vm260_vm2, %v2409_v42  ;;  %1873 = vmatmul.msk.f32.gmra.mxu3 %vm260_vm2, %v2412_v43 }
  0x7b   : > { %1907 = vmatmul.msk.f32.gmra.mxu0 %vm260_vm2, %v2266_v12 }
  0x81   : > { %1820 = vmatmul.msk.f32.gmra.mxu1 %vm260_vm2, %v2398_v41 }
  0x82   : > { %1838 = vmatmul.msk.f32.gmra.mxu2 %vm260_vm2, %v2423_v44  ;;  %1874 = vmatmul.msk.f32.gmra.mxu3 %vm260_vm2, %v2426_v45 }
  0x83   : > { %1908 = vmatmul.msk.f32.gmra.mxu0 %vm260_vm2, %v2296_v19 }
  0x89   : > { %1821 = vmatmul.msk.f32.gmra.mxu1 %vm260_vm2, %v2412_v43 }
  0x8a   : > { %1839 = vmatmul.msk.f32.gmra.mxu2 %vm260_vm2, %v2437_v46  ;;  %1875 = vmatmul.msk.f32.gmra.mxu3 %vm260_vm2, %v2440_v47 }
  0x8b   : > { %1909 = vmatmul.msk.f32.gmra.mxu0 %vm260_vm2, %v2313_v23 }
  0x91   : > { %1822 = vmatmul.msk.f32.gmra.mxu1 %vm260_vm2, %v2426_v45 }
  0x92   : > { %1840 = vmatmul.msk.f32.gmra.mxu2 %vm260_vm2, %v2451_v48  ;;  %1876 = vmatmul.msk.f32.gmra.mxu3 %vm260_vm2, %v2454_v49 }
  0x93   : > { %1910 = vmatmul.msk.f32.gmra.mxu0 %vm260_vm2, %v2242_v7 }
  0x99   : > { %1823 = vmatmul.msk.f32.gmra.mxu1 %vm260_vm2, %v2440_v47 }
  0x9a   : > { %1841 = vmatmul.msk.f32.gmra.mxu2 %vm260_vm2, %v2465_v50  ;;  %1877 = vmatmul.msk.f32.gmra.mxu3 %vm260_vm2, %v2468_v51 }
  0x9b   : > { %1911 = vmatmul.msk.f32.gmra.mxu0 %vm260_vm2, %v2273_v14 }
  0x9e   : > { %v2478_v52 = vpop.f32.mrf.mxu1 }
  0xa0   : > { %v330_v55 = vpop.f32.mrf.mxu0 }
  0xa1   : > { %1824 = vmatmul.msk.f32.gmra.mxu1 %vm260_vm2, %v2454_v49 }
  0xa2   : > { %1842 = vmatmul.msk.f32.gmra.mxu2 %vm260_vm2, %v2481_v53  ;;  %1878 = vmatmul.msk.f32.gmra.mxu3 %vm260_vm2, %v2484_v54 }
  0xa3   : > { %1912 = vmatmul.msk.f32.gmra.mxu0 %vm260_vm2, %v2299_v20 }
  0xa5   : > { %v2494_v56 = vpop.f32.mrf.mxu2  ;;  %v2496_v57 = vpop.f32.mrf.mxu3 }
  0xa6   : > { %v2498_v58 = vpop.f32.mrf.mxu1 }
  0xa8   : > { %v333_v61 = vpop.f32.mrf.mxu0 }
  0xa9   : > { %1825 = vmatmul.msk.f32.gmra.mxu1 %vm260_vm2, %v2468_v51 }
  0xaa   : > { %1843 = vmatmul.msk.f32.gmra.mxu2 %vm260_vm2, %v2501_v59  ;;  %1879 = vmatmul.msk.f32.gmra.mxu3 %vm260_vm2, %v2504_v60 }
  0xab   : > { %1913 = vmatmul.msk.f32.gmra.mxu0 %vm260_vm2, %v2316_v24 }
  0xad   : > { %v2514_v62 = vpop.f32.mrf.mxu2  ;;  %v2516_v63 = vpop.f32.mrf.mxu3 }
  0xae   : > { %2816 = vst [vmem:[#allocation2_spill] sm:$0xff] %v2516_v63  ;;  %v2518_v0 = vpop.f32.mrf.mxu1 }
  0xb0   : > { %v336_v3 = vpop.f32.mrf.mxu0 }
  0xb1   : > { %1826 = vmatmul.msk.f32.gmra.mxu1 %vm260_vm2, %v2484_v54 }
  0xb2   : > { %1844 = vmatmul.msk.f32.gmra.mxu2 %vm260_vm2, %v2521_v1  ;;  %1880 = vmatmul.msk.f32.gmra.mxu3 %vm260_vm2, %v2524_v2 }
  0xb3   : > { %1914 = vmatmul.msk.f32.gmra.mxu0 %vm260_vm2, %v2527_v4 }
  0xb5   : > { %v2537_v8 = vpop.f32.mrf.mxu2  ;;  %v2539_v9 = vpop.f32.mrf.mxu3 }
  0xb6   : > { %2817 = vst [vmem:[#allocation3_spill] sm:$0xff] %v2539_v9  ;;  %v2541_v10 = vpop.f32.mrf.mxu1 }
  0xb8   : > { %v339_v16 = vpop.f32.mrf.mxu0 }
  0xb9   : > { %1827 = vmatmul.msk.f32.gmra.mxu1 %vm260_vm2, %v2504_v60 }
  0xba   : > { %1845 = vmatmul.msk.f32.gmra.mxu2 %vm260_vm2, %v2544_v13  ;;  %1881 = vmatmul.msk.f32.gmra.mxu3 %vm260_vm2, %v2547_v15 }
  0xbb   : > { %1915 = vmatmul.msk.f32.gmra.mxu0 %vm260_vm2, %v2550_v17 }
  0xbd   : > { %v2560_v21 = vpop.f32.mrf.mxu2  ;;  %v2562_v25 = vpop.f32.mrf.mxu3 }
  0xbe   : > { %2819 = vst [vmem:[#allocation5_spill] sm:$0xff] %v2562_v25  ;;  %v446_v26 = vpop.f32.mrf.mxu1 }
  0xbf   : > { %v447_v28 = vadd.f32 %v446_v26, %v330_v55 }
  0xc0   : > { %v883_v27 = vpop.f32.mrf.mxu0 }
  0xc1   : > { %1934 = vmatmul.msk.f32.vlgmr.msra.gmra.mxu1 %vm260_vm2, %v2341_v32 }
  0xc2   : > { %1970 = vmatmul.msk.f32.vlgmr.msra.gmra.mxu2 %vm260_vm2, %v2344_v33  ;;  %2004 = vmatmul.msk.f32.vlgmr.msra.gmra.mxu3 %vm260_vm2, %v2236_v5 }
  0xc3   : > { %2038 = vmatmul.msk.f32.vlgmr.msra.gmra.mxu0 %vm260_vm2, %v2367_v36 }
  0xc5   : > { %v580_v29 = vpop.f32.mrf.mxu2  ;;  %v733_v31 = vpop.f32.mrf.mxu3 }
  0xc6   : > { %v628_v30 = vadd.f32 %v580_v29, %v447_v28  ;;  %v449_v9 = vpop.f32.mrf.mxu1 }
  0xc7   : > { %v450_v5 = vadd.f32 %v449_v9, %v333_v61 }
  0xc8   : > { %v781_v25 = vadd.f32 %v733_v31, %v628_v30  ;;  %v886_v63 = vpop.f32.mrf.mxu0 }
  0xc9   : > { %1935 = vmatmul.msk.f32.gmra.mxu1 %vm260_vm2, %v2354_v34 }
  0xca   : > { %v2572_v17 = vadd.f32 %v883_v27, %v781_v25  ;;  %1971 = vmatmul.msk.f32.gmra.mxu2 %vm260_vm2, %v2357_v35  ;;  %2005 = vmatmul.msk.f32.gmra.mxu3 %vm260_vm2, %v2263_v11 }
  0xcb   : > { %2039 = vmatmul.msk.f32.gmra.mxu0 %vm260_vm2, %v2381_v38 }
  0xcd   : > { %v583_v32 = vpop.f32.mrf.mxu2  ;;  %v736_v55 = vpop.f32.mrf.mxu3 }
  0xce   : > { %v629_v33 = vadd.f32 %v583_v32, %v450_v5  ;;  %v452_v26 = vpop.f32.mrf.mxu1 }
  0xcf   : > { %v453_v11 = vadd.f32 %v452_v26, %v336_v3 }
  0xd0   : > { %v782_v28 = vadd.f32 %v736_v55, %v629_v33  ;;  %v889_v25 = vpop.f32.mrf.mxu0 }
  0xd1   : > { %1936 = vmatmul.msk.f32.gmra.mxu1 %vm260_vm2, %v2367_v36 }
  0xd2   : > { %v2582_v27 = vadd.f32 %v886_v63, %v782_v28  ;;  %1972 = vmatmul.msk.f32.gmra.mxu2 %vm260_vm2, %v2370_v37  ;;  %2006 = vmatmul.msk.f32.gmra.mxu3 %vm260_vm2, %v2293_v18 }
  0xd3   : > { %2040 = vmatmul.msk.f32.gmra.mxu0 %vm260_vm2, %v2395_v40 }
  0xd5   : > { %v586_v34 = vpop.f32.mrf.mxu2  ;;  %v739_v61 = vpop.f32.mrf.mxu3 }
  0xd6   : > { %v630_v35 = vadd.f32 %v586_v34, %v453_v11  ;;  %v455_v9 = vpop.f32.mrf.mxu1 }
  0xd7   : > { %v456_v18 = vadd.f32 %v455_v9, %v339_v16 }
  0xd8   : > { %v783_v29 = vadd.f32 %v739_v61, %v630_v35  ;;  %v892_v63 = vpop.f32.mrf.mxu0 }
  0xd9   : > { %1937 = vmatmul.msk.f32.gmra.mxu1 %vm260_vm2, %v2381_v38 }
  0xda   : > { %v2592_v30 = vadd.f32 %v889_v25, %v783_v29  ;;  %1973 = vmatmul.msk.f32.gmra.mxu2 %vm260_vm2, %v2384_v39  ;;  %2007 = vmatmul.msk.f32.gmra.mxu3 %vm260_vm2, %v2310_v22 }
  0xdb   : > { %2041 = vmatmul.msk.f32.gmra.mxu0 %vm260_vm2, %v2409_v42 }
  0xdd   : > { %v589_v36 = vpop.f32.mrf.mxu2  ;;  %v742_v3 = vpop.f32.mrf.mxu3 }
  0xde   : > { %v631_v37 = vadd.f32 %v589_v36, %v456_v18  ;;  %v458_v31 = vpop.f32.mrf.mxu1 }
  0xdf   : > { %v459_v22 = vadd.f32 %v458_v31, %v2478_v52 }
  0xe0   : > { %v784_v5 = vadd.f32 %v742_v3, %v631_v37  ;;  %v895_v32 = vpop.f32.mrf.mxu0 }
  0xe1   : > { %1938 = vmatmul.msk.f32.gmra.mxu1 %vm260_vm2, %v2395_v40 }
  0xe2   : > { %v2602_v33 = vadd.f32 %v892_v63, %v784_v5  ;;  %1974 = vmatmul.msk.f32.gmra.mxu2 %vm260_vm2, %v2398_v41  ;;  %2008 = vmatmul.msk.f32.gmra.mxu3 %vm260_vm2, %v2239_v6 }
  0xe3   : > { %2042 = vmatmul.msk.f32.gmra.mxu0 %vm260_vm2, %v2423_v44 }
  0xe5   : > { %v592_v38 = vpop.f32.mrf.mxu2  ;;  %v745_v16 = vpop.f32.mrf.mxu3 }
  0xe6   : > { %v632_v39 = vadd.f32 %v592_v38, %v459_v22  ;;  %v461_v55 = vpop.f32.mrf.mxu1 }
  0xe7   : > { %v462_v6 = vadd.f32 %v461_v55, %v2498_v58 }
  0xe8   : > { %v785_v26 = vadd.f32 %v745_v16, %v632_v39  ;;  %v898_v28 = vpop.f32.mrf.mxu0 }
  0xe9   : > { %1939 = vmatmul.msk.f32.gmra.mxu1 %vm260_vm2, %v2409_v42 }
  0xea   : > { %v2613_v25 = vadd.f32 %v895_v32, %v785_v26  ;;  %1975 = vmatmul.msk.f32.gmra.mxu2 %vm260_vm2, %v2412_v43  ;;  %2009 = vmatmul.msk.f32.gmra.mxu3 %vm260_vm2, %v2266_v12 }
  0xeb   : > { %2043 = vmatmul.msk.f32.gmra.mxu0 %vm260_vm2, %v2437_v46 }
  0xed   : > { %v595_v40 = vpop.f32.mrf.mxu2  ;;  %v748_v52 = vpop.f32.mrf.mxu3 }
  0xee   : > { %v633_v41 = vadd.f32 %v595_v40, %v462_v6  ;;  %v464_v11 = vpop.f32.mrf.mxu1 }
  0xef   : > { %v465_v12 = vadd.f32 %v464_v11, %v2518_v0 }
  0xf0   : > { %v786_v34 = vadd.f32 %v748_v52, %v633_v41  ;;  %v901_v35 = vpop.f32.mrf.mxu0 }
  0xf1   : > { %1940 = vmatmul.msk.f32.gmra.mxu1 %vm260_vm2, %v2423_v44 }
  0xf2   : > { %v2624_v61 = vadd.f32 %v898_v28, %v786_v34  ;;  %1976 = vmatmul.msk.f32.gmra.mxu2 %vm260_vm2, %v2426_v45  ;;  %2010 = vmatmul.msk.f32.gmra.mxu3 %vm260_vm2, %v2296_v19 }
  0xf3   : > { %2044 = vmatmul.msk.f32.gmra.mxu0 %vm260_vm2, %v2451_v48 }
  0xf5   : > { %v598_v42 = vpop.f32.mrf.mxu2  ;;  %v751_v58 = vpop.f32.mrf.mxu3 }
  0xf6   : > { %v634_v43 = vadd.f32 %v598_v42, %v465_v12  ;;  %v467_v9 = vpop.f32.mrf.mxu1 }
  0xf7   : > { %v468_v19 = vadd.f32 %v467_v9, %v2541_v10 }
  0xf8   : > { %v787_v29 = vadd.f32 %v751_v58, %v634_v43  ;;  %v904_v63 = vpop.f32.mrf.mxu0 }
  0xf9   : > { %1941 = vmatmul.msk.f32.gmra.mxu1 %vm260_vm2, %v2437_v46 }
  0xfa   : > { %v2635_v18 = vadd.f32 %v901_v35, %v787_v29  ;;  %1977 = vmatmul.msk.f32.gmra.mxu2 %vm260_vm2, %v2440_v47  ;;  %2011 = vmatmul.msk.f32.gmra.mxu3 %vm260_vm2, %v2313_v23  ;;  %v2032_v35 = vld [vmem:[%s2231_s26 + $0xc2] sm:$0xff] }
  0xfb   : > { %2045 = vmatmul.msk.f32.gmra.mxu0 %vm260_vm2, %v2465_v50 }
  0xfd   : > { %v601_v44 = vpop.f32.mrf.mxu2  ;;  %v754_v0 = vpop.f32.mrf.mxu3 }
  0xfe   : > { %v635_v45 = vadd.f32 %v601_v44, %v468_v19  ;;  %v470_v36 = vpop.f32.mrf.mxu1 }
  0xff   : > { %v471_v23 = vadd.f32 %v470_v36, %v2494_v56  ;;  %v2000_v36 = vld [vmem:[%s2231_s26 + $0xd9] sm:$0xff] }
 0x100   : > { %v788_v37 = vadd.f32 %v754_v0, %v635_v45  ;;  %v907_v3 = vpop.f32.mrf.mxu0  ;;  %v1966_v45 = vld [vmem:[%s2231_s26 + $0xd8] sm:$0xff] }
 0x101   : > { %1942 = vmatmul.msk.f32.gmra.mxu1 %vm260_vm2, %v2451_v48 }
 0x102   : > { %v2646_v31 = vadd.f32 %v904_v63, %v788_v37  ;;  %1978 = vmatmul.msk.f32.gmra.mxu2 %vm260_vm2, %v2454_v49  ;;  %2012 = vmatmul.msk.f32.gmra.mxu3 %vm260_vm2, %v2242_v7  ;;  %v2034_v37 = vld [vmem:[%s2231_s26 + $0xda] sm:$0xff] }
 0x103   : > { %2046 = vmatmul.msk.f32.gmra.mxu0 %vm260_vm2, %v2481_v53 }
 0x105   : > { %v604_v46 = vpop.f32.mrf.mxu2  ;;  %v757_v10 = vpop.f32.mrf.mxu3 }
 0x106   : > { %v636_v47 = vadd.f32 %v604_v46, %v471_v23  ;;  %v473_v5 = vpop.f32.mrf.mxu1 }
 0x107   : > { %v474_v7 = vadd.f32 %v473_v5, %v2514_v62 }
 0x108   : > { %v789_v32 = vadd.f32 %v757_v10, %v636_v47  ;;  %v910_v22 = vpop.f32.mrf.mxu0 }
 0x109   : > { %1943 = vmatmul.msk.f32.gmra.mxu1 %vm260_vm2, %v2465_v50 }
 0x10a   : > { %v2657_v38 = vadd.f32 %v907_v3, %v789_v32  ;;  %1979 = vmatmul.msk.f32.gmra.mxu2 %vm260_vm2, %v2468_v51  ;;  %2013 = vmatmul.msk.f32.gmra.mxu3 %vm260_vm2, %v2273_v14  ;;  %v2822_v3 = vld [vmem:[#allocation3_spill] sm:$0xff]  ;;  %v1967_v32 = vld [vmem:[%s2231_s26 + $0xe0] sm:$0xff] }
 0x10b   : > { %2047 = vmatmul.msk.f32.gmra.mxu0 %vm260_vm2, %v2501_v59 }
 0x10d   : > { %v607_v48 = vpop.f32.mrf.mxu2  ;;  %v760_v56 = vpop.f32.mrf.mxu3 }
 0x10e   : > { %v637_v49 = vadd.f32 %v607_v48, %v474_v7  ;;  %v476_v39 = vpop.f32.mrf.mxu1  ;;  %v2001_v7 = vld [vmem:[%s2231_s26 + $0xe1] sm:$0xff] }
 0x10f   : > { %v477_v14 = vadd.f32 %v476_v39, %v2537_v8  ;;  %v2823_v39 = vld [vmem:[#allocation5_spill] sm:$0xff] }
 0x110   : > { %v790_v16 = vadd.f32 %v760_v56, %v637_v49  ;;  %v913_v55 = vpop.f32.mrf.mxu0  ;;  %v2035_v49 = vld [vmem:[%s2231_s26 + $0xe2] sm:$0xff] }
 0x111   : > { %1944 = vmatmul.msk.f32.gmra.mxu1 %vm260_vm2, %v2481_v53 }
 0x112   : > { %v2668_v26 = vadd.f32 %v910_v22, %v790_v16  ;;  %1980 = vmatmul.msk.f32.gmra.mxu2 %vm260_vm2, %v2484_v54  ;;  %2014 = vmatmul.msk.f32.gmra.mxu3 %vm260_vm2, %v2299_v20 }
 0x113   : > { %2048 = vmatmul.msk.f32.gmra.mxu0 %vm260_vm2, %v2521_v1 }
 0x115   : > { %v610_v50 = vpop.f32.mrf.mxu2  ;;  %v763_v62 = vpop.f32.mrf.mxu3 }
 0x116   : > { %v638_v51 = vadd.f32 %v610_v50, %v477_v14  ;;  %v479_v28 = vpop.f32.mrf.mxu1 }
 0x117   : > { %v480_v20 = vadd.f32 %v479_v28, %v2560_v21 }
 0x118   : > { %v791_v6 = vadd.f32 %v763_v62, %v638_v51  ;;  %v916_v40 = vpop.f32.mrf.mxu0 }
 0x119   : > { %1945 = vmatmul.msk.f32.gmra.mxu1 %vm260_vm2, %v2501_v59 }
 0x11a   : > { %v2679_v41 = vadd.f32 %v913_v55, %v791_v6  ;;  %1981 = vmatmul.msk.f32.gmra.mxu2 %vm260_vm2, %v2504_v60  ;;  %2015 = vmatmul.msk.f32.gmra.mxu3 %vm260_vm2, %v2316_v24 }
 0x11b   : > { %2049 = vmatmul.msk.f32.gmra.mxu0 %vm260_vm2, %v2544_v13 }
 0x11d   : > { %v613_v53 = vpop.f32.mrf.mxu2  ;;  %v766_v8 = vpop.f32.mrf.mxu3 }
 0x11e   : > { %v639_v54 = vadd.f32 %v613_v53, %v480_v20  ;;  %v482_v52 = vpop.f32.mrf.mxu1 }
 0x11f   : > { %v483_v24 = vadd.f32 %v482_v52, %v2496_v57  ;;  %v2820_v57 = vld [vmem:[#allocation4_spill] sm:$0xff] }
 0x120   : > { %v792_v11 = vadd.f32 %v766_v8, %v639_v54  ;;  %v919_v34 = vpop.f32.mrf.mxu0 }
 0x121   : > { %1946 = vmatmul.msk.f32.gmra.mxu1 %vm260_vm2, %v2521_v1  ;;  %v2033_v1 = vld [vmem:[%s2231_s26 + $0xca] sm:$0xff] }
 0x122   : > { %v2691_v59 = vadd.f32 %v916_v40, %v792_v11  ;;  %1982 = vmatmul.msk.f32.gmra.mxu2 %vm260_vm2, %v2524_v2  ;;  %2016 = vmatmul.msk.f32.gmra.mxu3 %vm260_vm2, %v2527_v4  ;;  %v2821_v2 = vld [vmem:[#allocation2_spill] sm:$0xff] }
 0x123   : > { %2050 = vmatmul.msk.f32.gmra.mxu0 %vm260_vm2, %v2032_v35 }
 0x125   : > { %v616_v60 = vpop.f32.mrf.mxu2  ;;  %v769_v12 = vpop.f32.mrf.mxu3 }
 0x126   : > { %v640_v21 = vadd.f32 %v616_v60, %v483_v24  ;;  %v485_v42 = vpop.f32.mrf.mxu1 }
 0x127   : > { %v486_v4 = vadd.f32 %v485_v42, %v2821_v2 }
 0x128   : > { %v793_v43 = vadd.f32 %v769_v12, %v640_v21  ;;  %v922_v58 = vpop.f32.mrf.mxu0 }
 0x129   : > { %1947 = vmatmul.msk.f32.gmra.mxu1 %vm260_vm2, %v2544_v13 }
 0x12a   : > { %v2702_v9 = vadd.f32 %v919_v34, %v793_v43  ;;  %1983 = vmatmul.msk.f32.gmra.mxu2 %vm260_vm2, %v2547_v15  ;;  %2017 = vmatmul.msk.f32.gmra.mxu3 %vm260_vm2, %v2820_v57 }
 0x12b   : > { %2051 = vmatmul.msk.f32.gmra.mxu0 %vm260_vm2, %v2033_v1 }
 0x12d   : > { %v619_v29 = vpop.f32.mrf.mxu2  ;;  %v772_v19 = vpop.f32.mrf.mxu3 }
 0x12e   : > { %v641_v63 = vadd.f32 %v619_v29, %v486_v4  ;;  %v488_v44 = vpop.f32.mrf.mxu1 }
 0x12f   : > { %v489_v23 = vadd.f32 %v488_v44, %v2822_v3 }
 0x130   : > { %v794_v0 = vadd.f32 %v772_v19, %v641_v63  ;;  %v925_v13 = vpop.f32.mrf.mxu0 }
 0x131   : > { %1948 = vmatmul.msk.f32.gmra.mxu1 %vm260_vm2, %v2032_v35 }
 0x132   : > { %v2715_v15 = vadd.f32 %v922_v58, %v794_v0  ;;  %1984 = vmatmul.msk.f32.gmra.mxu2 %vm260_vm2, %v1966_v45  ;;  %2018 = vmatmul.msk.f32.gmra.mxu3 %vm260_vm2, %v2000_v36 }
 0x133   : > { %2052 = vmatmul.msk.f32.gmra.mxu0 %vm260_vm2, %v2034_v37 }
 0x135   : > { %v622_v46 = vpop.f32.mrf.mxu2  ;;  %v775_v10 = vpop.f32.mrf.mxu3 }
 0x136   : > { %v642_v47 = vadd.f32 %v622_v46, %v489_v23  ;;  %v491_v5 = vpop.f32.mrf.mxu1 }
 0x137   : > { %v492_v16 = vadd.f32 %v491_v5, %v2823_v39 }
 0x138   : > { %v795_v22 = vadd.f32 %v775_v10, %v642_v47  ;;  %v928_v48 = vpop.f32.mrf.mxu0 }
 0x139   : > { %1949 = vmatmul.msk.f32.gmra.mxu1 %vm260_vm2, %v2033_v1 }
 0x13a   : > { %v2725_v56 = vadd.f32 %v925_v13, %v795_v22  ;;  %1985 = vmatmul.msk.f32.gmra.mxu2 %vm260_vm2, %v1967_v32  ;;  %2019 = vmatmul.msk.f32.gmra.mxu3 %vm260_vm2, %v2001_v7 }
 0x13b   : > { %2053 = vmatmul.msk.f32.gmra.mxu0 %vm260_vm2, %v2035_v49 }
 0x13d   : > { %v625_v55 = vpop.f32.mrf.mxu2  ;;  %v778_v50 = vpop.f32.mrf.mxu3 }
 0x13e   : > { %v643_v14 = vadd.f32 %v625_v55, %v492_v16  ;;  %v1033_v51 = vpop.f32.mrf.mxu1 }
 0x13f   : > { %v1081_v40 = vadd.f32 %v1033_v51, %v2572_v17 }
 0x140   : > { %v796_v62 = vadd.f32 %v778_v50, %v643_v14  ;;  %v1486_v28 = vpop.f32.mrf.mxu0 }
 0x142   : > { %v2732_v6 = vadd.f32 %v928_v48, %v796_v62 }
 0x145   : > { %v1186_v20 = vpop.f32.mrf.mxu2  ;;  %v1336_v54 = vpop.f32.mrf.mxu3 }
 0x146   : > { %v1234_v53 = vadd.f32 %v1186_v20, %v1081_v40  ;;  %v1036_v8 = vpop.f32.mrf.mxu1 }
 0x147   : > { %v1082_v35 = vadd.f32 %v1036_v8, %v2582_v27 }
 0x148   : > { %v1384_v52 = vadd.f32 %v1336_v54, %v1234_v53  ;;  %v1489_v11 = vpop.f32.mrf.mxu0 }
 0x14a   : > { %v1534_v34 = vadd.f32 %v1486_v28, %v1384_v52 }
 0x14c   : > { %1648 = vxpose.xlu0.b32.start [1/16] (narrow) %v1534_v34, 8  ;;  %v1593_v58 = vmul.f32 %v1534_v34, %v1534_v34  ;;  %v1552_v17 = vsel %vm1551_vm3, %v1534_v34, 0.0 }
 0x14d   : > { %v1189_v24 = vpop.f32.mrf.mxu2  ;;  %v1339_v21 = vpop.f32.mrf.mxu3 }
 0x14e   : > { %v1235_v60 = vadd.f32 %v1189_v24, %v1082_v35  ;;  %v1039_v12 = vpop.f32.mrf.mxu1  ;;  %v1609_v63 = vsel %vm1551_vm3, %v1593_v58, 0.0 }
 0x14f   : > { %v1083_v57 = vadd.f32 %v1039_v12, %v2592_v30 }
 0x150   : > { %v1385_v42 = vadd.f32 %v1339_v21, %v1235_v60  ;;  %v1492_v43 = vpop.f32.mrf.mxu0 }
 0x152   : > { %v1535_v1 = vadd.f32 %v1489_v11, %v1385_v42 }
 0x154   : > { %v1553_v2 = vsel %vm1551_vm3, %v1535_v1, 0.0  ;;  %v1594_v4 = vmul.f32 %v1535_v1, %v1535_v1  ;;  %1649 = vxpose.xlu0.b32.cont [2/16] (narrow) %v1535_v1, 8 }
 0x155   : > { %v1554_v29 = vadd.f32 %v1553_v2, %v1552_v17  ;;  %v1192_v27 = vpop.f32.mrf.mxu2  ;;  %v1342_v45 = vpop.f32.mrf.mxu3 }
 0x156   : > { %v1610_v19 = vsel %vm1551_vm3, %v1594_v4, 0.0  ;;  %v1236_v44 = vadd.f32 %v1192_v27, %v1083_v57  ;;  %v1042_v36 = vpop.f32.mrf.mxu1 }
 0x157   : > { %v1611_v0 = vadd.f32 %v1610_v19, %v1609_v63  ;;  %v1084_v23 = vadd.f32 %v1042_v36, %v2602_v33 }
 0x158   : > { %v1386_v13 = vadd.f32 %v1342_v45, %v1236_v44  ;;  %v1495_v37 = vpop.f32.mrf.mxu0 }
 0x15a   : > { %v1536_v3 = vadd.f32 %v1492_v43, %v1386_v13 }
 0x15c   : > { %v1555_v30 = vsel %vm1551_vm3, %v1536_v3, 0.0  ;;  %v1595_v46 = vmul.f32 %v1536_v3, %v1536_v3  ;;  %1650 = vxpose.xlu0.b32.cont [3/16] (narrow) %v1536_v3, 8 }
 0x15d   : > { %v1556_v47 = vadd.f32 %v1555_v30, %v1554_v29  ;;  %v1195_v10 = vpop.f32.mrf.mxu2  ;;  %v1345_v22 = vpop.f32.mrf.mxu3 }
 0x15e   : > { %v1612_v5 = vsel %vm1551_vm3, %v1595_v46, 0.0  ;;  %v1237_v32 = vadd.f32 %v1195_v10, %v1084_v23  ;;  %v1045_v48 = vpop.f32.mrf.mxu1 }
 0x15f   : > { %v1613_v7 = vadd.f32 %v1612_v5, %v1611_v0  ;;  %v1085_v55 = vadd.f32 %v1045_v48, %v2613_v25 }
 0x160   : > { %v1387_v49 = vadd.f32 %v1345_v22, %v1237_v32  ;;  %v1498_v39 = vpop.f32.mrf.mxu0 }
 0x162   : > { %v1537_v16 = vadd.f32 %v1495_v37, %v1387_v49 }
 0x164   : > { %v1557_v14 = vsel %vm1551_vm3, %v1537_v16, 0.0  ;;  %v1596_v33 = vmul.f32 %v1537_v16, %v1537_v16  ;;  %1651 = vxpose.xlu0.b32.cont [4/16] (narrow) %v1537_v16, 8 }
 0x165   : > { %v1558_v50 = vadd.f32 %v1557_v14, %v1556_v47  ;;  %v1198_v51 = vpop.f32.mrf.mxu2  ;;  %v1348_v40 = vpop.f32.mrf.mxu3 }
 0x166   : > { %v1614_v62 = vsel %vm1551_vm3, %v1596_v33, 0.0  ;;  %v1238_v28 = vadd.f32 %v1198_v51, %v1085_v55  ;;  %v1048_v53 = vpop.f32.mrf.mxu1 }
 0x167   : > { %v1615_v20 = vadd.f32 %v1614_v62, %v1613_v7  ;;  %v1086_v11 = vadd.f32 %v1048_v53, %v2624_v61 }
 0x168   : > { %v1388_v54 = vadd.f32 %v1348_v40, %v1238_v28  ;;  %v1501_v8 = vpop.f32.mrf.mxu0 }
 0x16a   : > { %v1538_v52 = vadd.f32 %v1498_v39, %v1388_v54 }
 0x16c   : > { %v1559_v34 = vsel %vm1551_vm3, %v1538_v52, 0.0  ;;  %v1597_v25 = vmul.f32 %v1538_v52, %v1538_v52  ;;  %1652 = vxpose.xlu0.b32.cont [5/16] (narrow) %v1538_v52, 8 }
 0x16d   : > { %v1560_v35 = vadd.f32 %v1559_v34, %v1558_v50  ;;  %v1201_v24 = vpop.f32.mrf.mxu2  ;;  %v1351_v12 = vpop.f32.mrf.mxu3 }
 0x16e   : > { %v1616_v60 = vsel %vm1551_vm3, %v1597_v25, 0.0  ;;  %v1239_v21 = vadd.f32 %v1201_v24, %v1086_v11  ;;  %v1051_v43 = vpop.f32.mrf.mxu1 }
 0x16f   : > { %v1617_v42 = vadd.f32 %v1616_v60, %v1615_v20  ;;  %v1087_v57 = vadd.f32 %v1051_v43, %v2635_v18 }
 0x170   : > { %v1389_v58 = vadd.f32 %v1351_v12, %v1239_v21  ;;  %v1504_v1 = vpop.f32.mrf.mxu0 }
 0x172   : > { %v1539_v17 = vadd.f32 %v1501_v8, %v1389_v58 }
 0x174   : > { %v1561_v2 = vsel %vm1551_vm3, %v1539_v17, 0.0  ;;  %v1598_v61 = vmul.f32 %v1539_v17, %v1539_v17  ;;  %1653 = vxpose.xlu0.b32.cont [6/16] (narrow) %v1539_v17, 8 }
 0x175   : > { %v1562_v4 = vadd.f32 %v1561_v2, %v1560_v35  ;;  %v1204_v29 = vpop.f32.mrf.mxu2  ;;  %v1354_v19 = vpop.f32.mrf.mxu3 }
 0x176   : > { %v1618_v27 = vsel %vm1551_vm3, %v1598_v61, 0.0  ;;  %v1240_v63 = vadd.f32 %v1204_v29, %v1087_v57  ;;  %v1054_v45 = vpop.f32.mrf.mxu1 }
 0x177   : > { %v1619_v44 = vadd.f32 %v1618_v27, %v1617_v42  ;;  %v1088_v37 = vadd.f32 %v1054_v45, %v2646_v31 }
 0x178   : > { %v1390_v0 = vadd.f32 %v1354_v19, %v1240_v63  ;;  %v1507_v36 = vpop.f32.mrf.mxu0 }
 0x17a   : > { %v1540_v13 = vadd.f32 %v1504_v1, %v1390_v0 }
 0x17c   : > { %v1563_v3 = vsel %vm1551_vm3, %v1540_v13, 0.0  ;;  %v1599_v18 = vmul.f32 %v1540_v13, %v1540_v13  ;;  %1654 = vxpose.xlu0.b32.cont [7/16] (narrow) %v1540_v13, 8 }
 0x17d   : > { %v1564_v23 = vadd.f32 %v1563_v3, %v1562_v4  ;;  %v1207_v30 = vpop.f32.mrf.mxu2  ;;  %v1357_v10 = vpop.f32.mrf.mxu3 }
 0x17e   : > { %v1620_v46 = vsel %vm1551_vm3, %v1599_v18, 0.0  ;;  %v1241_v47 = vadd.f32 %v1207_v30, %v1088_v37  ;;  %v1057_v32 = vpop.f32.mrf.mxu1 }
 0x17f   : > { %v1621_v5 = vadd.f32 %v1620_v46, %v1619_v44  ;;  %v1089_v49 = vadd.f32 %v1057_v32, %v2657_v38 }
 0x180   : > { %v1391_v22 = vadd.f32 %v1357_v10, %v1241_v47  ;;  %v1510_v7 = vpop.f32.mrf.mxu0 }
 0x182   : > { %v1541_v48 = vadd.f32 %v1507_v36, %v1391_v22 }
 0x184   : > { %v1565_v39 = vsel %vm1551_vm3, %v1541_v48, 0.0  ;;  %v1600_v31 = vmul.f32 %v1541_v48, %v1541_v48  ;;  %1655 = vxpose.xlu0.b32.cont [8/16] (narrow) %v1541_v48, 8 }
 0x185   : > { %v1566_v16 = vadd.f32 %v1565_v39, %v1564_v23  ;;  %v1210_v55 = vpop.f32.mrf.mxu2  ;;  %v1360_v50 = vpop.f32.mrf.mxu3 }
 0x186   : > { %v1622_v14 = vsel %vm1551_vm3, %v1600_v31, 0.0  ;;  %v1242_v33 = vadd.f32 %v1210_v55, %v1089_v49  ;;  %v1060_v62 = vpop.f32.mrf.mxu1 }
 0x187   : > { %v1623_v51 = vadd.f32 %v1622_v14, %v1621_v5  ;;  %v1090_v53 = vadd.f32 %v1060_v62, %v2668_v26 }
 0x188   : > { %v1392_v28 = vadd.f32 %v1360_v50, %v1242_v33  ;;  %v1513_v40 = vpop.f32.mrf.mxu0 }
 0x18a   : > { %v1542_v20 = vadd.f32 %v1510_v7, %v1392_v28 }
 0x18c   : > { %v1567_v54 = vsel %vm1551_vm3, %v1542_v20, 0.0  ;;  %v1601_v38 = vmul.f32 %v1542_v20, %v1542_v20  ;;  %1656 = vxpose.xlu0.b32.cont [9/16] (narrow) %v1542_v20, 8 }
 0x18d   : > { %v1568_v8 = vadd.f32 %v1567_v54, %v1566_v16  ;;  %v1213_v52 = vpop.f32.mrf.mxu2  ;;  %v1363_v25 = vpop.f32.mrf.mxu3 }
 0x18e   : > { %v1624_v11 = vsel %vm1551_vm3, %v1601_v38, 0.0  ;;  %v1243_v34 = vadd.f32 %v1213_v52, %v1090_v53  ;;  %v1063_v24 = vpop.f32.mrf.mxu1 }
 0x18f   : > { %v1625_v35 = vadd.f32 %v1624_v11, %v1623_v51  ;;  %v1091_v42 = vadd.f32 %v1063_v24, %v2679_v41 }
 0x190   : > { %v1393_v60 = vadd.f32 %v1363_v25, %v1243_v34  ;;  %v1516_v21 = vpop.f32.mrf.mxu0 }
 0x192   : > { %v1543_v12 = vadd.f32 %v1513_v40, %v1393_v60 }
 0x194   : > { %v1569_v43 = vsel %vm1551_vm3, %v1543_v12, 0.0  ;;  %v1602_v26 = vmul.f32 %v1543_v12, %v1543_v12  ;;  %1657 = vxpose.xlu0.b32.cont [10/16] (narrow) %v1543_v12, 8 }
 0x195   : > { %v1570_v58 = vadd.f32 %v1569_v43, %v1568_v8  ;;  %v1216_v1 = vpop.f32.mrf.mxu2  ;;  %v1366_v2 = vpop.f32.mrf.mxu3 }
 0x196   : > { %v1626_v17 = vsel %vm1551_vm3, %v1602_v26, 0.0  ;;  %v1244_v57 = vadd.f32 %v1216_v1, %v1091_v42  ;;  %v1066_v4 = vpop.f32.mrf.mxu1 }
 0x197   : > { %v1627_v61 = vadd.f32 %v1626_v17, %v1625_v35  ;;  %v1092_v19 = vadd.f32 %v1066_v4, %v2691_v59 }
 0x198   : > { %v1394_v29 = vadd.f32 %v1366_v2, %v1244_v57  ;;  %v1519_v27 = vpop.f32.mrf.mxu0 }
 0x19a   : > { %v1544_v63 = vadd.f32 %v1516_v21, %v1394_v29 }
 0x19c   : > { %v1571_v44 = vsel %vm1551_vm3, %v1544_v63, 0.0  ;;  %v1603_v41 = vmul.f32 %v1544_v63, %v1544_v63  ;;  %1658 = vxpose.xlu0.b32.cont [11/16] (narrow) %v1544_v63, 8 }
 0x19d   : > { %v1572_v45 = vadd.f32 %v1571_v44, %v1570_v58  ;;  %v1219_v0 = vpop.f32.mrf.mxu2  ;;  %v1369_v37 = vpop.f32.mrf.mxu3 }
 0x19e   : > { %v1628_v36 = vsel %vm1551_vm3, %v1603_v41, 0.0  ;;  %v1245_v13 = vadd.f32 %v1219_v0, %v1092_v19  ;;  %v1069_v18 = vpop.f32.mrf.mxu1 }
 0x19f   : > { %v1629_v3 = vadd.f32 %v1628_v36, %v1627_v61  ;;  %v1093_v47 = vadd.f32 %v1069_v18, %v2702_v9 }
 0x1a0   : > { %v1395_v23 = vadd.f32 %v1369_v37, %v1245_v13  ;;  %v1522_v30 = vpop.f32.mrf.mxu0 }
 0x1a2   : > { %v1545_v46 = vadd.f32 %v1519_v27, %v1395_v23 }
 0x1a4   : > { %v1573_v10 = vsel %vm1551_vm3, %v1545_v46, 0.0  ;;  %v1604_v59 = vmul.f32 %v1545_v46, %v1545_v46  ;;  %1659 = vxpose.xlu0.b32.cont [12/16] (narrow) %v1545_v46, 8 }
 0x1a5   : > { %v1574_v5 = vadd.f32 %v1573_v10, %v1572_v45  ;;  %v1222_v32 = vpop.f32.mrf.mxu2  ;;  %v1372_v48 = vpop.f32.mrf.mxu3 }
 0x1a6   : > { %v1630_v22 = vsel %vm1551_vm3, %v1604_v59, 0.0  ;;  %v1246_v7 = vadd.f32 %v1222_v32, %v1093_v47  ;;  %v1072_v39 = vpop.f32.mrf.mxu1  ;;  %v1550_v47 = vld [vmem:[%s2813_s3] sm:$0x1] }
 0x1a7   : > { %v1631_v49 = vadd.f32 %v1630_v22, %v1629_v3  ;;  %v1094_v14 = vadd.f32 %v1072_v39, %v2715_v15 }
 0x1a8   : > { %v1396_v31 = vadd.f32 %v1372_v48, %v1246_v7  ;;  %v1525_v55 = vpop.f32.mrf.mxu0 }
 0x1aa   : > { %v1546_v16 = vadd.f32 %v1522_v30, %v1396_v31 }
 0x1ac   : > { %v1575_v33 = vsel %vm1551_vm3, %v1546_v16, 0.0  ;;  %v1605_v9 = vmul.f32 %v1546_v16, %v1546_v16  ;;  %1660 = vxpose.xlu0.b32.cont [13/16] (narrow) %v1546_v16, 8 }
 0x1ad   : > { %v1576_v50 = vadd.f32 %v1575_v33, %v1574_v5  ;;  %v1225_v51 = vpop.f32.mrf.mxu2  ;;  %v1375_v40 = vpop.f32.mrf.mxu3  ;;  %v1592_v5 = vld [vmem:[%s2814_s4] sm:$0x1] }
 0x1ae   : > { %v1632_v62 = vsel %vm1551_vm3, %v1605_v9, 0.0  ;;  %v1247_v28 = vadd.f32 %v1225_v51, %v1094_v14  ;;  %v1075_v53 = vpop.f32.mrf.mxu1 }
 0x1af   : > { %v1633_v20 = vadd.f32 %v1632_v62, %v1631_v49  ;;  %v1095_v8 = vadd.f32 %v1075_v53, %v2725_v56 }
 0x1b0   : > { %v1397_v54 = vadd.f32 %v1375_v40, %v1247_v28  ;;  %v1528_v25 = vpop.f32.mrf.mxu0 }
 0x1b2   : > { %v1547_v38 = vadd.f32 %v1525_v55, %v1397_v54 }
 0x1b4   : > { %v1577_v52 = vsel %vm1551_vm3, %v1547_v38, 0.0  ;;  %v1606_v11 = vmul.f32 %v1547_v38, %v1547_v38  ;;  %1661 = vxpose.xlu0.b32.cont [14/16] (narrow) %v1547_v38, 8 }
 0x1b5   : > { %v1578_v15 = vadd.f32 %v1577_v52, %v1576_v50  ;;  %v1228_v34 = vpop.f32.mrf.mxu2  ;;  %v1378_v60 = vpop.f32.mrf.mxu3 }
 0x1b6   : > { %v1634_v35 = vsel %vm1551_vm3, %v1606_v11, 0.0  ;;  %v1248_v24 = vadd.f32 %v1228_v34, %v1095_v8  ;;  %v1078_v42 = vpop.f32.mrf.mxu1 }
 0x1b7   : > { %v1635_v21 = vadd.f32 %v1634_v35, %v1633_v20  ;;  %v1096_v26 = vadd.f32 %v1078_v42, %v2732_v6 }
 0x1b8   : > { %v1398_v12 = vadd.f32 %v1378_v60, %v1248_v24  ;;  %v1531_v29 = vpop.f32.mrf.mxu0 }
 0x1ba   : > { %v1548_v43 = vadd.f32 %v1528_v25, %v1398_v12 }
 0x1bc   : > { %v1579_v58 = vsel %vm1551_vm3, %v1548_v43, 0.0  ;;  %v1607_v56 = vmul.f32 %v1548_v43, %v1548_v43  ;;  %1662 = vxpose.xlu0.b32.cont [15/16] (narrow) %v1548_v43, 8 }
 0x1bd   : > { %v1580_v1 = vadd.f32 %v1579_v58, %v1578_v15  ;;  %v1231_v17 = vpop.f32.mrf.mxu2  ;;  %v1381_v61 = vpop.f32.mrf.mxu3 }
 0x1be   : > { %v1636_v57 = vsel %vm1551_vm3, %v1607_v56, 0.0  ;;  %v1249_v2 = vadd.f32 %v1231_v17, %v1096_v26 }
 0x1bf   : > { %v1637_v4 = vadd.f32 %v1636_v57, %v1635_v21 }
 0x1c0   : > { %v1399_v27 = vadd.f32 %v1381_v61, %v1249_v2 }
 0x1c2   : > { %v1549_v63 = vadd.f32 %v1531_v29, %v1399_v27 }
 0x1c4   : > { %v1581_v19 = vsel %vm1551_vm3, %v1549_v63, 0.0  ;;  %v1608_v44 = vmul.f32 %v1549_v63, %v1549_v63  ;;  %1663 = vxpose.xlu0.b32.end [16/16] (narrow) %v1549_v63, 8 }
 0x1c5   : > { %v1582_v41 = vadd.f32 %v1581_v19, %v1580_v1 }
 0x1c6   : > { %v1638_v6 = vsel %vm1551_vm3, %v1608_v44, 0.0 }
 0x1c7   : > { %v1583_v45 = vrot.slane %v1582_v41, 4  ;;  %v1639_v0 = vadd.f32 %v1638_v6, %v1637_v4 }
 0x1c9   : > { %v1584_v36 = vadd.f32 %v1583_v45, %v1582_v41  ;;  %v1640_v13 = vrot.slane %v1639_v0, 4 }
 0x1cb   : > { %v1585_v37 = vrot.slane %v1584_v36, 2  ;;  %v1641_v3 = vadd.f32 %v1640_v13, %v1639_v0 }
 0x1cd   : > { %v1586_v18 = vadd.f32 %v1585_v37, %v1584_v36  ;;  %v1642_v23 = vrot.slane %v1641_v3, 2 }
 0x1cf   : > { %v1587_v30 = vrot.slane %v1586_v18, 1  ;;  %v1643_v46 = vadd.f32 %v1642_v23, %v1641_v3 }
 0x1d1   : > { %v1588_v10 = vadd.f32 %v1587_v30, %v1586_v18  ;;  %v1644_v59 = vrot.slane %v1643_v46, 1 }
 0x1d3   : > { %v1589_v32 = vadd.f32 %v1588_v10, %v1550_v47  ;;  %v1645_v22 = vadd.f32 %v1644_v59, %v1643_v46 }
 0x1d5   : > { %1591 = vst.msk [vmem:[%s2813_s3] sm:$0x1] %vm1590_vm4, %v1589_v32  ;;  %v1646_v7 = vadd.f32 %v1645_v22, %v1592_v5 }
 0x1d7   : > { %1647 = vst.msk [vmem:[%s2814_s4] sm:$0x1] %vm1590_vm4, %v1646_v7 }
 0x1f0   : > { %v1664_v48 = vpop.trf.xlu0 }
 0x1f1   : > { %1680 = vst [vmem:[%s2208_s6] sm:$0xff] %v1664_v48 }
 0x1f2 PF: > { %s15_s19 = sadd.s32 1, %s2139_s19   ;;  %s2824_s15 = smov %s2131_s17 }
 0x1f3   : > { %p12_p10 = scmp.ge.s32.totalorder %s15_s19, 6   ;;  %s2825_s16 = smov %s2135_s18 }
 0x1f4   : > { %s2826_s17 = smov %s2829_s20  ;;  %s2827_s18 = smov %s2833_s21 }
 0x1f5   :  { %14 = sbr.rel (!%p12_p10) target bundleno = 3 (0x3), region = 89 }

</bundles_post_ra>
